<compile_context>
chip_gen: v7x
topology: tpu7x:2x2x1
jax: 0.10.0
libtpu: 0.0.40
codegen_flags: <defaults>
</compile_context>

<pallas_src>
import math

import jax
import jax.numpy as jnp
from jax.experimental import pallas as pl
from jax.experimental.pallas import tpu as pltpu

# ----------------------------- model config ---------------------------------
B = 2            # batch
S = 8            # sequence length
H = 32           # hidden_size
NUM_HEADS = 4
DH = H // NUM_HEADS
F = 64           # FFN intermediate size
L = 2            # number of encoder layers
V = 64           # vocab size
NUM_LABELS = 1   # classifier output dim
LN_EPS = 1e-12   # BERT layernorm eps
NEG_INF = -1e9
BS = B * S       # flattened rows

# NOTE: at these toy shapes every vreg/MXU tile is mostly masked (H=32 of 128
# lanes); when real ESM/BERT sizes land, H/F should be multiples of 128 and
# per-layer weights streamed with a grid axis over L.


def _gelu_tanh(x):
    # tanh-approx GELU (BERT "gelu_new"); EUP-friendly on TPU.
    return 0.5 * x * (1.0 + jnp.tanh(0.7978845608028654 * (x + 0.044715 * x * x * x)))


def _layer_norm(v, g, b):
    mu = jnp.mean(v, axis=-1, keepdims=True)
    var = jnp.mean((v - mu) * (v - mu), axis=-1, keepdims=True)
    return (v - mu) * jax.lax.rsqrt(var + LN_EPS) * g + b


# ------------------------------ Pallas kernel --------------------------------
def encoder_classifier_kernel(
    x_ref,      # (BS, H)            embedded tokens, whole batch flattened
    bias_ref,   # (B*NUM_HEADS*S, S) pre-stacked additive attention bias
    wqkv_ref,   # (L, H, 3H)
    bqkv_ref,   # (L, 3H)
    wo_ref,     # (L, H, H)
    bo_ref,     # (L, H)
    ln1g_ref,   # (L, H)
    ln1b_ref,   # (L, H)
    w1_ref,     # (L, H, F)
    b1_ref,     # (L, F)
    w2_ref,     # (L, F, H)
    b2_ref,     # (L, H)
    ln2g_ref,   # (L, H)
    ln2b_ref,   # (L, H)
    wct_ref,    # (NUM_LABELS, H)    classifier weight, pre-transposed
    bc_ref,     # (1, NUM_LABELS)
    out_ref,    # (BS, NUM_LABELS)
    ctx_ref,    # VMEM scratch (BS, H)  per-head context assembly
):
    x = x_ref[...]                       # [BS, H]
    bias = bias_ref[...]                 # [B*NH*S, S]

    bqkv = bqkv_ref[...]
    bo = bo_ref[...]
    ln1g = ln1g_ref[...]
    ln1b = ln1b_ref[...]
    b1 = b1_ref[...]
    b2 = b2_ref[...]
    ln2g = ln2g_ref[...]
    ln2b = ln2b_ref[...]

    scale = 1.0 / math.sqrt(DH)

    for l in range(L):  # static unrolled layer loop
        # --- fused QKV projection over the whole flattened batch ---
        qkv = jnp.dot(x, wqkv_ref[l], preferred_element_type=jnp.float32)
        qkv = qkv + bqkv[l:l + 1, :]                  # [BS, 3H]
        q = qkv[:, 0:H] * scale
        k = qkv[:, H:2 * H]
        v = qkv[:, 2 * H:3 * H]

        # one K transpose per layer (avoids per-head implicit vxpose from
        # last-vs-last dot_general contractions)
        kT = k.T                                      # [H, BS]

        # --- attention scores: stack all (batch, head) tiles on sublanes ---
        tiles = []
        for b in range(B):
            qb = q[b * S:(b + 1) * S, :]              # [S, H]
            for h in range(NUM_HEADS):
                tiles.append(jnp.dot(
                    qb[:, h * DH:(h + 1) * DH],
                    kT[h * DH:(h + 1) * DH, b * S:(b + 1) * S],
                    preferred_element_type=jnp.float32))      # [S, S]
        s = jnp.concatenate(tiles, axis=0) + bias     # [B*NH*S, S]

        # batched softmax: one max/exp/sum/reciprocal pass for all heads
        s = s - jnp.max(s, axis=-1, keepdims=True)
        p = jnp.exp(s)
        p = p * pl.reciprocal(jnp.sum(p, axis=-1, keepdims=True), approx=True)

        # --- context: per-(b,h) PV matmul written into VMEM scratch at its
        #     lane offset (no value-level concat) ---
        for b in range(B):
            vb = v[b * S:(b + 1) * S, :]              # [S, H]
            for h in range(NUM_HEADS):
                r = (b * NUM_HEADS + h) * S
                ctx_ref[pl.ds(b * S, S), pl.ds(h * DH, DH)] = jnp.dot(
                    p[r:r + S, :], vb[:, h * DH:(h + 1) * DH],
                    preferred_element_type=jnp.float32)
        ctx = ctx_ref[...]                            # [BS, H]

        attn_out = jnp.dot(ctx, wo_ref[l], preferred_element_type=jnp.float32)
        attn_out = attn_out + bo[l:l + 1, :]
        x = _layer_norm(x + attn_out, ln1g[l:l + 1, :], ln1b[l:l + 1, :])

        # --- feed-forward ---
        hid = jnp.dot(x, w1_ref[l], preferred_element_type=jnp.float32)
        hid = _gelu_tanh(hid + b1[l:l + 1, :])
        ffn = jnp.dot(hid, w2_ref[l], preferred_element_type=jnp.float32)
        ffn = ffn + b2[l:l + 1, :]
        x = _layer_norm(x + ffn, ln2g[l:l + 1, :], ln2b[l:l + 1, :])

    # --- per-token classifier: VPU multiply + lane reduce (no N=1 MXU push) ---
    wct = wct_ref[...]                                # [NUM_LABELS, H]
    bc = bc_ref[...]                                  # [1, NUM_LABELS]
    cols = [jnp.sum(x * wct[n:n + 1, :], axis=-1, keepdims=True)
            for n in range(NUM_LABELS)]
    logits = cols[0] if NUM_LABELS == 1 else jnp.concatenate(cols, axis=-1)
    out_ref[...] = logits + bc                        # [BS, NUM_LABELS]


# ------------------------------- wrapper -------------------------------------
@jax.jit
def ptm_forward(input_ids, attention_mask, params):
    """input_ids: int32 [B, S]; attention_mask: int/float [B, S]."""
    # Glue (plain JAX): embedding gather + position embeddings + embedding LN.
    tok = jnp.take(params["tok_emb"], input_ids, axis=0)           # [B, S, H]
    pos = params["pos_emb"][None, :S, :]                           # [1, S, H]
    x = _layer_norm(tok + pos, params["emb_ln_g"][None, None, :],
                    params["emb_ln_b"][None, None, :]).astype(jnp.float32)
    x_flat = x.reshape(BS, H)                                      # [B*S, H]

    # Pre-stacked additive attention bias, row layout matches the kernel's
    # (batch-outer, head-inner, query-row) score stacking.
    maskf = attention_mask.astype(jnp.float32)                     # [B, S]
    bias = (1.0 - maskf) * NEG_INF                                 # [B, S]
    bias_stacked = jnp.repeat(bias, NUM_HEADS * S, axis=0)         # [B*NH*S, S]

    vmem_specs = [pl.BlockSpec(memory_space=pltpu.MemorySpace.VMEM)
                  for _ in range(16)]

    out_flat = pl.pallas_call(
        encoder_classifier_kernel,
        out_shape=jax.ShapeDtypeStruct((BS, NUM_LABELS), jnp.float32),
        in_specs=vmem_specs,
        out_specs=pl.BlockSpec(memory_space=pltpu.MemorySpace.VMEM),
        scratch_shapes=[pltpu.VMEM((BS, H), jnp.float32)],
    )(
        x_flat, bias_stacked,
        params["wqkv"], params["bqkv"], params["wo"], params["bo"],
        params["ln1g"], params["ln1b"], params["w1"], params["b1"],
        params["w2"], params["b2"], params["ln2g"], params["ln2b"],
        params["wc"].T, params["bc"],
    )
    return out_flat.reshape(B, S, NUM_LABELS)


# --------------------------- pure-JAX reference ------------------------------
def ptm_forward_ref(input_ids, attention_mask, params):
    tok = jnp.take(params["tok_emb"], input_ids, axis=0)
    pos = params["pos_emb"][None, :S, :]
    x = _layer_norm(tok + pos, params["emb_ln_g"], params["emb_ln_b"])
    mask = attention_mask.astype(jnp.float32)                     # [B, S]
    bias = (1.0 - mask)[:, None, None, :] * NEG_INF               # [B,1,1,S]
    scale = 1.0 / math.sqrt(DH)
    for l in range(L):
        qkv = x @ params["wqkv"][l] + params["bqkv"][l]
        q, k, v = jnp.split(qkv, 3, axis=-1)
        q = q.reshape(B, S, NUM_HEADS, DH).transpose(0, 2, 1, 3)
        k = k.reshape(B, S, NUM_HEADS, DH).transpose(0, 2, 1, 3)
        v = v.reshape(B, S, NUM_HEADS, DH).transpose(0, 2, 1, 3)
        s = jnp.einsum("bhqd,bhkd->bhqk", q, k) * scale + bias
        p = jax.nn.softmax(s, axis=-1)
        ctx = jnp.einsum("bhqk,bhkd->bhqd", p, v)
        ctx = ctx.transpose(0, 2, 1, 3).reshape(B, S, H)
        attn_out = ctx @ params["wo"][l] + params["bo"][l]
        x = _layer_norm(x + attn_out, params["ln1g"][l], params["ln1b"][l])
        hid = _gelu_tanh(x @ params["w1"][l] + params["b1"][l])
        ffn = hid @ params["w2"][l] + params["b2"][l]
        x = _layer_norm(x + ffn, params["ln2g"][l], params["ln2b"][l])
    return x @ params["wc"] + params["bc"]


# ------------------------------ param init -----------------------------------
def init_params(key):
    ks = jax.random.split(key, 16)
    n = lambda k, shape: (0.02 * jax.random.normal(k, shape)).astype(jnp.float32)
    return {
        "tok_emb": n(ks[0], (V, H)),
        "pos_emb": n(ks[1], (S, H)),
        "emb_ln_g": jnp.ones((H,), jnp.float32),
        "emb_ln_b": jnp.zeros((H,), jnp.float32),
        "wqkv": n(ks[2], (L, H, 3 * H)),
        "bqkv": jnp.zeros((L, 3 * H), jnp.float32),
        "wo": n(ks[3], (L, H, H)),
        "bo": jnp.zeros((L, H), jnp.float32),
        "ln1g": jnp.ones((L, H), jnp.float32),
        "ln1b": jnp.zeros((L, H), jnp.float32),
        "w1": n(ks[4], (L, H, F)),
        "b1": jnp.zeros((L, F), jnp.float32),
        "w2": n(ks[5], (L, F, H)),
        "b2": jnp.zeros((L, H), jnp.float32),
        "ln2g": jnp.ones((L, H), jnp.float32),
        "ln2b": jnp.zeros((L, H), jnp.float32),
        "wc": n(ks[6], (H, NUM_LABELS)),
        "bc": jnp.zeros((1, NUM_LABELS), jnp.float32),
    }


if __name__ == "__main__":
    key = jax.random.PRNGKey(0)
    k_ids, k_params = jax.random.split(key)
    params = init_params(k_params)

    input_ids = jax.random.randint(k_ids, (B, S), 0, V, dtype=jnp.int32)
    # pad the tail of the second sequence to exercise the attention mask
    attention_mask = jnp.ones((B, S), jnp.int32).at[1, 6:].set(0)

    logits = ptm_forward(input_ids, attention_mask, params)
    logits = jax.block_until_ready(logits)

    ref = ptm_forward_ref(input_ids, attention_mask, params)
    assert logits.shape == (B, S, NUM_LABELS)
    assert jnp.allclose(logits, ref, rtol=1e-4, atol=1e-4), (
        f"max abs err {jnp.max(jnp.abs(logits - ref))}")

    # TODO(synk): backbone dropout / freeze flags and pretrained-weight loading
    # are training/checkpoint-time concerns; the kernel implements eval-mode
    # forward (dropout = identity) with synthetic deterministic weights.
    print("KERNEL_OK")
</pallas_src>

<mosaic_0001>
module attributes {stable_mosaic.version = 11 : i64} {
  func.func @encoder_classifier_kernel(%arg0: memref<16x32xf32, #tpu.memory_space<vmem>>, %arg1: memref<64x8xf32, #tpu.memory_space<vmem>>, %arg2: memref<2x32x96xf32, #tpu.memory_space<vmem>>, %arg3: memref<2x96xf32, #tpu.memory_space<vmem>>, %arg4: memref<2x32x32xf32, #tpu.memory_space<vmem>>, %arg5: memref<2x32xf32, #tpu.memory_space<vmem>>, %arg6: memref<2x32xf32, #tpu.memory_space<vmem>>, %arg7: memref<2x32xf32, #tpu.memory_space<vmem>>, %arg8: memref<2x32x64xf32, #tpu.memory_space<vmem>>, %arg9: memref<2x64xf32, #tpu.memory_space<vmem>>, %arg10: memref<2x64x32xf32, #tpu.memory_space<vmem>>, %arg11: memref<2x32xf32, #tpu.memory_space<vmem>>, %arg12: memref<2x32xf32, #tpu.memory_space<vmem>>, %arg13: memref<2x32xf32, #tpu.memory_space<vmem>>, %arg14: memref<1x32xf32, #tpu.memory_space<vmem>>, %arg15: memref<1x1xf32, #tpu.memory_space<vmem>>, %arg16: memref<16x1xf32, #tpu.memory_space<vmem>>, %arg17: memref<16x32xf32, #tpu.memory_space<vmem>>) attributes {dimension_semantics = [], scalar_prefetch = 0 : i64, scratch_operands = 1 : i64, tpu.core_type = #tpu.core_type<tc>} {
    %c0 = arith.constant 0 : index
    %c0_0 = arith.constant 0 : index
    %0 = vector.load %arg0[%c0, %c0_0] : memref<16x32xf32, #tpu.memory_space<vmem>>, vector<16x32xf32>
    %c0_1 = arith.constant 0 : index
    %c0_2 = arith.constant 0 : index
    %1 = vector.load %arg1[%c0_1, %c0_2] : memref<64x8xf32, #tpu.memory_space<vmem>>, vector<64x8xf32>
    %c0_3 = arith.constant 0 : index
    %c0_4 = arith.constant 0 : index
    %2 = vector.load %arg3[%c0_3, %c0_4] : memref<2x96xf32, #tpu.memory_space<vmem>>, vector<2x96xf32>
    %c0_5 = arith.constant 0 : index
    %c0_6 = arith.constant 0 : index
    %3 = vector.load %arg5[%c0_5, %c0_6] : memref<2x32xf32, #tpu.memory_space<vmem>>, vector<2x32xf32>
    %c0_7 = arith.constant 0 : index
    %c0_8 = arith.constant 0 : index
    %4 = vector.load %arg6[%c0_7, %c0_8] : memref<2x32xf32, #tpu.memory_space<vmem>>, vector<2x32xf32>
    %c0_9 = arith.constant 0 : index
    %c0_10 = arith.constant 0 : index
    %5 = vector.load %arg7[%c0_9, %c0_10] : memref<2x32xf32, #tpu.memory_space<vmem>>, vector<2x32xf32>
    %c0_11 = arith.constant 0 : index
    %c0_12 = arith.constant 0 : index
    %6 = vector.load %arg9[%c0_11, %c0_12] : memref<2x64xf32, #tpu.memory_space<vmem>>, vector<2x64xf32>
    %c0_13 = arith.constant 0 : index
    %c0_14 = arith.constant 0 : index
    %7 = vector.load %arg11[%c0_13, %c0_14] : memref<2x32xf32, #tpu.memory_space<vmem>>, vector<2x32xf32>
    %c0_15 = arith.constant 0 : index
    %c0_16 = arith.constant 0 : index
    %8 = vector.load %arg12[%c0_15, %c0_16] : memref<2x32xf32, #tpu.memory_space<vmem>>, vector<2x32xf32>
    %c0_17 = arith.constant 0 : index
    %c0_18 = arith.constant 0 : index
    %9 = vector.load %arg13[%c0_17, %c0_18] : memref<2x32xf32, #tpu.memory_space<vmem>>, vector<2x32xf32>
    %c0_19 = arith.constant 0 : index
    %c0_20 = arith.constant 0 : index
    %c0_21 = arith.constant 0 : index
    %10 = vector.load %arg2[%c0_19, %c0_20, %c0_21] : memref<2x32x96xf32, #tpu.memory_space<vmem>>, vector<1x32x96xf32>
    %11 = vector.shape_cast %10 : vector<1x32x96xf32> to vector<32x96xf32>
    %cst = arith.constant dense<0.000000e+00> : vector<16x96xf32>
    %12 = tpu.matmul %0, %11, %cst {dimension_numbers = #tpu.dot_dimension_numbers<[1], [0], [0], [1], [0, 0, 1, 1], [], []>} : vector<16x32xf32>, vector<32x96xf32>, vector<16x96xf32> -> vector<16x96xf32>
    %13 = vector.extract_strided_slice %2 {offsets = [0, 0], sizes = [1, 96], strides = [1, 1]} : vector<2x96xf32> to vector<1x96xf32>
    %14 = vector.broadcast %13 : vector<1x96xf32> to vector<16x96xf32>
    %15 = arith.addf %12, %14 : vector<16x96xf32>
    %16 = vector.extract_strided_slice %15 {offsets = [0, 0], sizes = [16, 32], strides = [1, 1]} : vector<16x96xf32> to vector<16x32xf32>
    %cst_22 = arith.constant 0.353553385 : f32
    %17 = vector.broadcast %cst_22 : f32 to vector<16x32xf32>
    %18 = arith.mulf %16, %17 : vector<16x32xf32>
    %19 = vector.extract_strided_slice %15 {offsets = [0, 32], sizes = [16, 32], strides = [1, 1]} : vector<16x96xf32> to vector<16x32xf32>
    %20 = vector.extract_strided_slice %15 {offsets = [0, 64], sizes = [16, 32], strides = [1, 1]} : vector<16x96xf32> to vector<16x32xf32>
    %21 = tpu.transpose %19, [1, 0] : vector<16x32xf32> -> vector<32x16xf32>
    %22 = vector.extract_strided_slice %18 {offsets = [0, 0], sizes = [8, 32], strides = [1, 1]} : vector<16x32xf32> to vector<8x32xf32>
    %23 = vector.extract_strided_slice %22 {offsets = [0, 0], sizes = [8, 8], strides = [1, 1]} : vector<8x32xf32> to vector<8x8xf32>
    %24 = vector.extract_strided_slice %21 {offsets = [0, 0], sizes = [8, 8], strides = [1, 1]} : vector<32x16xf32> to vector<8x8xf32>
    %cst_23 = arith.constant dense<0.000000e+00> : vector<8x8xf32>
    %25 = tpu.matmul %23, %24, %cst_23 {dimension_numbers = #tpu.dot_dimension_numbers<[1], [0], [0], [1], [0, 0, 1, 1], [], []>} : vector<8x8xf32>, vector<8x8xf32>, vector<8x8xf32> -> vector<8x8xf32>
    %26 = vector.extract_strided_slice %22 {offsets = [0, 8], sizes = [8, 8], strides = [1, 1]} : vector<8x32xf32> to vector<8x8xf32>
    %27 = vector.extract_strided_slice %21 {offsets = [8, 0], sizes = [8, 8], strides = [1, 1]} : vector<32x16xf32> to vector<8x8xf32>
    %cst_24 = arith.constant dense<0.000000e+00> : vector<8x8xf32>
    %28 = tpu.matmul %26, %27, %cst_24 {dimension_numbers = #tpu.dot_dimension_numbers<[1], [0], [0], [1], [0, 0, 1, 1], [], []>} : vector<8x8xf32>, vector<8x8xf32>, vector<8x8xf32> -> vector<8x8xf32>
    %29 = vector.extract_strided_slice %22 {offsets = [0, 16], sizes = [8, 8], strides = [1, 1]} : vector<8x32xf32> to vector<8x8xf32>
    %30 = vector.extract_strided_slice %21 {offsets = [16, 0], sizes = [8, 8], strides = [1, 1]} : vector<32x16xf32> to vector<8x8xf32>
    %cst_25 = arith.constant dense<0.000000e+00> : vector<8x8xf32>
    %31 = tpu.matmul %29, %30, %cst_25 {dimension_numbers = #tpu.dot_dimension_numbers<[1], [0], [0], [1], [0, 0, 1, 1], [], []>} : vector<8x8xf32>, vector<8x8xf32>, vector<8x8xf32> -> vector<8x8xf32>
    %32 = vector.extract_strided_slice %22 {offsets = [0, 24], sizes = [8, 8], strides = [1, 1]} : vector<8x32xf32> to vector<8x8xf32>
    %33 = vector.extract_strided_slice %21 {offsets = [24, 0], sizes = [8, 8], strides = [1, 1]} : vector<32x16xf32> to vector<8x8xf32>
    %cst_26 = arith.constant dense<0.000000e+00> : vector<8x8xf32>
    %34 = tpu.matmul %32, %33, %cst_26 {dimension_numbers = #tpu.dot_dimension_numbers<[1], [0], [0], [1], [0, 0, 1, 1], [], []>} : vector<8x8xf32>, vector<8x8xf32>, vector<8x8xf32> -> vector<8x8xf32>
    %35 = vector.extract_strided_slice %18 {offsets = [8, 0], sizes = [8, 32], strides = [1, 1]} : vector<16x32xf32> to vector<8x32xf32>
    %36 = vector.extract_strided_slice %35 {offsets = [0, 0], sizes = [8, 8], strides = [1, 1]} : vector<8x32xf32> to vector<8x8xf32>
    %37 = vector.extract_strided_slice %21 {offsets = [0, 8], sizes = [8, 8], strides = [1, 1]} : vector<32x16xf32> to vector<8x8xf32>
    %cst_27 = arith.constant dense<0.000000e+00> : vector<8x8xf32>
    %38 = tpu.matmul %36, %37, %cst_27 {dimension_numbers = #tpu.dot_dimension_numbers<[1], [0], [0], [1], [0, 0, 1, 1], [], []>} : vector<8x8xf32>, vector<8x8xf32>, vector<8x8xf32> -> vector<8x8xf32>
    %39 = vector.extract_strided_slice %35 {offsets = [0, 8], sizes = [8, 8], strides = [1, 1]} : vector<8x32xf32> to vector<8x8xf32>
    %40 = vector.extract_strided_slice %21 {offsets = [8, 8], sizes = [8, 8], strides = [1, 1]} : vector<32x16xf32> to vector<8x8xf32>
    %cst_28 = arith.constant dense<0.000000e+00> : vector<8x8xf32>
    %41 = tpu.matmul %39, %40, %cst_28 {dimension_numbers = #tpu.dot_dimension_numbers<[1], [0], [0], [1], [0, 0, 1, 1], [], []>} : vector<8x8xf32>, vector<8x8xf32>, vector<8x8xf32> -> vector<8x8xf32>
    %42 = vector.extract_strided_slice %35 {offsets = [0, 16], sizes = [8, 8], strides = [1, 1]} : vector<8x32xf32> to vector<8x8xf32>
    %43 = vector.extract_strided_slice %21 {offsets = [16, 8], sizes = [8, 8], strides = [1, 1]} : vector<32x16xf32> to vector<8x8xf32>
    %cst_29 = arith.constant dense<0.000000e+00> : vector<8x8xf32>
    %44 = tpu.matmul %42, %43, %cst_29 {dimension_numbers = #tpu.dot_dimension_numbers<[1], [0], [0], [1], [0, 0, 1, 1], [], []>} : vector<8x8xf32>, vector<8x8xf32>, vector<8x8xf32> -> vector<8x8xf32>
    %45 = vector.extract_strided_slice %35 {offsets = [0, 24], sizes = [8, 8], strides = [1, 1]} : vector<8x32xf32> to vector<8x8xf32>
    %46 = vector.extract_strided_slice %21 {offsets = [24, 8], sizes = [8, 8], strides = [1, 1]} : vector<32x16xf32> to vector<8x8xf32>
    %cst_30 = arith.constant dense<0.000000e+00> : vector<8x8xf32>
    %47 = tpu.matmul %45, %46, %cst_30 {dimension_numbers = #tpu.dot_dimension_numbers<[1], [0], [0], [1], [0, 0, 1, 1], [], []>} : vector<8x8xf32>, vector<8x8xf32>, vector<8x8xf32> -> vector<8x8xf32>
    %48 = tpu.concatenate %25, %28, %31, %34, %38, %41, %44, %47 in 0 : vector<8x8xf32>, vector<8x8xf32>, vector<8x8xf32>, vector<8x8xf32>, vector<8x8xf32>, vector<8x8xf32>, vector<8x8xf32>, vector<8x8xf32> -> vector<64x8xf32>
    %49 = arith.addf %48, %1 : vector<64x8xf32>
    %cst_31 = arith.constant dense<0xFF800000> : vector<64xf32>
    %50 = vector.multi_reduction <maximumf>, %49, %cst_31 [1] : vector<64x8xf32> to vector<64xf32>
    %51 = vector.shape_cast %50 : vector<64xf32> to vector<64x1xf32>
    %52 = vector.broadcast %51 : vector<64x1xf32> to vector<64x8xf32>
    %53 = arith.subf %49, %52 : vector<64x8xf32>
    %54 = math.exp %53 : vector<64x8xf32>
    %cst_32 = arith.constant dense<0.000000e+00> : vector<64xf32>
    %55 = vector.multi_reduction <add>, %54, %cst_32 [1] : vector<64x8xf32> to vector<64xf32>
    %56 = vector.shape_cast %55 : vector<64xf32> to vector<64x1xf32>
    %57 = tpu.reciprocal %56 {approx = true} : vector<64x1xf32> -> vector<64x1xf32>
    %58 = vector.broadcast %57 : vector<64x1xf32> to vector<64x8xf32>
    %59 = arith.mulf %54, %58 : vector<64x8xf32>
    %60 = vector.extract_strided_slice %20 {offsets = [0, 0], sizes = [8, 32], strides = [1, 1]} : vector<16x32xf32> to vector<8x32xf32>
    %61 = vector.extract_strided_slice %59 {offsets = [0, 0], sizes = [8, 8], strides = [1, 1]} : vector<64x8xf32> to vector<8x8xf32>
    %62 = vector.extract_strided_slice %60 {offsets = [0, 0], sizes = [8, 8], strides = [1, 1]} : vector<8x32xf32> to vector<8x8xf32>
    %cst_33 = arith.constant dense<0.000000e+00> : vector<8x8xf32>
    %63 = tpu.matmul %61, %62, %cst_33 {dimension_numbers = #tpu.dot_dimension_numbers<[1], [0], [0], [1], [0, 0, 1, 1], [], []>} : vector<8x8xf32>, vector<8x8xf32>, vector<8x8xf32> -> vector<8x8xf32>
    %c0_34 = arith.constant 0 : index
    %c0_35 = arith.constant 0 : index
    %64 = vector.load %arg17[%c0_34, %c0_35] : memref<16x32xf32, #tpu.memory_space<vmem>>, vector<8x8xf32>
    tpu.vector_store %arg17[%c0_34, %c0_35], %63 {strides = array<i32>} : memref<16x32xf32, #tpu.memory_space<vmem>>, vector<8x8xf32>,
    %65 = vector.extract_strided_slice %59 {offsets = [8, 0], sizes = [8, 8], strides = [1, 1]} : vector<64x8xf32> to vector<8x8xf32>
    %66 = vector.extract_strided_slice %60 {offsets = [0, 8], sizes = [8, 8], strides = [1, 1]} : vector<8x32xf32> to vector<8x8xf32>
    %cst_36 = arith.constant dense<0.000000e+00> : vector<8x8xf32>
    %67 = tpu.matmul %65, %66, %cst_36 {dimension_numbers = #tpu.dot_dimension_numbers<[1], [0], [0], [1], [0, 0, 1, 1], [], []>} : vector<8x8xf32>, vector<8x8xf32>, vector<8x8xf32> -> vector<8x8xf32>
    %c0_37 = arith.constant 0 : index
    %c8 = arith.constant 8 : index
    %68 = vector.load %arg17[%c0_37, %c8] : memref<16x32xf32, #tpu.memory_space<vmem>>, vector<8x8xf32>
    tpu.vector_store %arg17[%c0_37, %c8], %67 {strides = array<i32>} : memref<16x32xf32, #tpu.memory_space<vmem>>, vector<8x8xf32>,
    %69 = vector.extract_strided_slice %59 {offsets = [16, 0], sizes = [8, 8], strides = [1, 1]} : vector<64x8xf32> to vector<8x8xf32>
    %70 = vector.extract_strided_slice %60 {offsets = [0, 16], sizes = [8, 8], strides = [1, 1]} : vector<8x32xf32> to vector<8x8xf32>
    %cst_38 = arith.constant dense<0.000000e+00> : vector<8x8xf32>
    %71 = tpu.matmul %69, %70, %cst_38 {dimension_numbers = #tpu.dot_dimension_numbers<[1], [0], [0], [1], [0, 0, 1, 1], [], []>} : vector<8x8xf32>, vector<8x8xf32>, vector<8x8xf32> -> vector<8x8xf32>
    %c0_39 = arith.constant 0 : index
    %c16 = arith.constant 16 : index
    %72 = vector.load %arg17[%c0_39, %c16] : memref<16x32xf32, #tpu.memory_space<vmem>>, vector<8x8xf32>
    tpu.vector_store %arg17[%c0_39, %c16], %71 {strides = array<i32>} : memref<16x32xf32, #tpu.memory_space<vmem>>, vector<8x8xf32>,
    %73 = vector.extract_strided_slice %59 {offsets = [24, 0], sizes = [8, 8], strides = [1, 1]} : vector<64x8xf32> to vector<8x8xf32>
    %74 = vector.extract_strided_slice %60 {offsets = [0, 24], sizes = [8, 8], strides = [1, 1]} : vector<8x32xf32> to vector<8x8xf32>
    %cst_40 = arith.constant dense<0.000000e+00> : vector<8x8xf32>
    %75 = tpu.matmul %73, %74, %cst_40 {dimension_numbers = #tpu.dot_dimension_numbers<[1], [0], [0], [1], [0, 0, 1, 1], [], []>} : vector<8x8xf32>, vector<8x8xf32>, vector<8x8xf32> -> vector<8x8xf32>
    %c0_41 = arith.constant 0 : index
    %c24 = arith.constant 24 : index
    %76 = vector.load %arg17[%c0_41, %c24] : memref<16x32xf32, #tpu.memory_space<vmem>>, vector<8x8xf32>
    tpu.vector_store %arg17[%c0_41, %c24], %75 {strides = array<i32>} : memref<16x32xf32, #tpu.memory_space<vmem>>, vector<8x8xf32>,
    %77 = vector.extract_strided_slice %20 {offsets = [8, 0], sizes = [8, 32], strides = [1, 1]} : vector<16x32xf32> to vector<8x32xf32>
    %78 = vector.extract_strided_slice %59 {offsets = [32, 0], sizes = [8, 8], strides = [1, 1]} : vector<64x8xf32> to vector<8x8xf32>
    %79 = vector.extract_strided_slice %77 {offsets = [0, 0], sizes = [8, 8], strides = [1, 1]} : vector<8x32xf32> to vector<8x8xf32>
    %cst_42 = arith.constant dense<0.000000e+00> : vector<8x8xf32>
    %80 = tpu.matmul %78, %79, %cst_42 {dimension_numbers = #tpu.dot_dimension_numbers<[1], [0], [0], [1], [0, 0, 1, 1], [], []>} : vector<8x8xf32>, vector<8x8xf32>, vector<8x8xf32> -> vector<8x8xf32>
    %c8_43 = arith.constant 8 : index
    %c0_44 = arith.constant 0 : index
    %81 = vector.load %arg17[%c8_43, %c0_44] : memref<16x32xf32, #tpu.memory_space<vmem>>, vector<8x8xf32>
    tpu.vector_store %arg17[%c8_43, %c0_44], %80 {strides = array<i32>} : memref<16x32xf32, #tpu.memory_space<vmem>>, vector<8x8xf32>,
    %82 = vector.extract_strided_slice %59 {offsets = [40, 0], sizes = [8, 8], strides = [1, 1]} : vector<64x8xf32> to vector<8x8xf32>
    %83 = vector.extract_strided_slice %77 {offsets = [0, 8], sizes = [8, 8], strides = [1, 1]} : vector<8x32xf32> to vector<8x8xf32>
    %cst_45 = arith.constant dense<0.000000e+00> : vector<8x8xf32>
    %84 = tpu.matmul %82, %83, %cst_45 {dimension_numbers = #tpu.dot_dimension_numbers<[1], [0], [0], [1], [0, 0, 1, 1], [], []>} : vector<8x8xf32>, vector<8x8xf32>, vector<8x8xf32> -> vector<8x8xf32>
    %c8_46 = arith.constant 8 : index
    %c8_47 = arith.constant 8 : index
    %85 = vector.load %arg17[%c8_46, %c8_47] : memref<16x32xf32, #tpu.memory_space<vmem>>, vector<8x8xf32>
    tpu.vector_store %arg17[%c8_46, %c8_47], %84 {strides = array<i32>} : memref<16x32xf32, #tpu.memory_space<vmem>>, vector<8x8xf32>,
    %86 = vector.extract_strided_slice %59 {offsets = [48, 0], sizes = [8, 8], strides = [1, 1]} : vector<64x8xf32> to vector<8x8xf32>
    %87 = vector.extract_strided_slice %77 {offsets = [0, 16], sizes = [8, 8], strides = [1, 1]} : vector<8x32xf32> to vector<8x8xf32>
    %cst_48 = arith.constant dense<0.000000e+00> : vector<8x8xf32>
    %88 = tpu.matmul %86, %87, %cst_48 {dimension_numbers = #tpu.dot_dimension_numbers<[1], [0], [0], [1], [0, 0, 1, 1], [], []>} : vector<8x8xf32>, vector<8x8xf32>, vector<8x8xf32> -> vector<8x8xf32>
    %c8_49 = arith.constant 8 : index
    %c16_50 = arith.constant 16 : index
    %89 = vector.load %arg17[%c8_49, %c16_50] : memref<16x32xf32, #tpu.memory_space<vmem>>, vector<8x8xf32>
    tpu.vector_store %arg17[%c8_49, %c16_50], %88 {strides = array<i32>} : memref<16x32xf32, #tpu.memory_space<vmem>>, vector<8x8xf32>,
    %90 = vector.extract_strided_slice %59 {offsets = [56, 0], sizes = [8, 8], strides = [1, 1]} : vector<64x8xf32> to vector<8x8xf32>
    %91 = vector.extract_strided_slice %77 {offsets = [0, 24], sizes = [8, 8], strides = [1, 1]} : vector<8x32xf32> to vector<8x8xf32>
    %cst_51 = arith.constant dense<0.000000e+00> : vector<8x8xf32>
    %92 = tpu.matmul %90, %91, %cst_51 {dimension_numbers = #tpu.dot_dimension_numbers<[1], [0], [0], [1], [0, 0, 1, 1], [], []>} : vector<8x8xf32>, vector<8x8xf32>, vector<8x8xf32> -> vector<8x8xf32>
    %c8_52 = arith.constant 8 : index
    %c24_53 = arith.constant 24 : index
    %93 = vector.load %arg17[%c8_52, %c24_53] : memref<16x32xf32, #tpu.memory_space<vmem>>, vector<8x8xf32>
    tpu.vector_store %arg17[%c8_52, %c24_53], %92 {strides = array<i32>} : memref<16x32xf32, #tpu.memory_space<vmem>>, vector<8x8xf32>,
    %c0_54 = arith.constant 0 : index
    %c0_55 = arith.constant 0 : index
    %94 = vector.load %arg17[%c0_54, %c0_55] : memref<16x32xf32, #tpu.memory_space<vmem>>, vector<16x32xf32>
    %c0_56 = arith.constant 0 : index
    %c0_57 = arith.constant 0 : index
    %c0_58 = arith.constant 0 : index
    %95 = vector.load %arg4[%c0_56, %c0_57, %c0_58] : memref<2x32x32xf32, #tpu.memory_space<vmem>>, vector<1x32x32xf32>
    %96 = vector.shape_cast %95 : vector<1x32x32xf32> to vector<32x32xf32>
    %cst_59 = arith.constant dense<0.000000e+00> : vector<16x32xf32>
    %97 = tpu.matmul %94, %96, %cst_59 {dimension_numbers = #tpu.dot_dimension_numbers<[1], [0], [0], [1], [0, 0, 1, 1], [], []>} : vector<16x32xf32>, vector<32x32xf32>, vector<16x32xf32> -> vector<16x32xf32>
    %98 = vector.extract_strided_slice %3 {offsets = [0, 0], sizes = [1, 32], strides = [1, 1]} : vector<2x32xf32> to vector<1x32xf32>
    %99 = vector.broadcast %98 : vector<1x32xf32> to vector<16x32xf32>
    %100 = arith.addf %97, %99 : vector<16x32xf32>
    %101 = arith.addf %0, %100 : vector<16x32xf32>
    %102 = vector.extract_strided_slice %4 {offsets = [0, 0], sizes = [1, 32], strides = [1, 1]} : vector<2x32xf32> to vector<1x32xf32>
    %103 = vector.extract_strided_slice %5 {offsets = [0, 0], sizes = [1, 32], strides = [1, 1]} : vector<2x32xf32> to vector<1x32xf32>
    %cst_60 = arith.constant dense<0.000000e+00> : vector<16xf32>
    %104 = vector.multi_reduction <add>, %101, %cst_60 [1] : vector<16x32xf32> to vector<16xf32>
    %105 = vector.shape_cast %104 : vector<16xf32> to vector<16x1xf32>
    %cst_61 = arith.constant 3.200000e+01 : f32
    %106 = vector.broadcast %cst_61 : f32 to vector<16x1xf32>
    %107 = arith.divf %105, %106 : vector<16x1xf32>
    %108 = vector.broadcast %107 : vector<16x1xf32> to vector<16x32xf32>
    %109 = arith.subf %101, %108 : vector<16x32xf32>
    %110 = vector.broadcast %107 : vector<16x1xf32> to vector<16x32xf32>
    %111 = arith.subf %101, %110 : vector<16x32xf32>
    %112 = arith.mulf %109, %111 : vector<16x32xf32>
    %cst_62 = arith.constant dense<0.000000e+00> : vector<16xf32>
    %113 = vector.multi_reduction <add>, %112, %cst_62 [1] : vector<16x32xf32> to vector<16xf32>
    %114 = vector.shape_cast %113 : vector<16xf32> to vector<16x1xf32>
    %cst_63 = arith.constant 3.200000e+01 : f32
    %115 = vector.broadcast %cst_63 : f32 to vector<16x1xf32>
    %116 = arith.divf %114, %115 : vector<16x1xf32>
    %117 = vector.broadcast %107 : vector<16x1xf32> to vector<16x32xf32>
    %118 = arith.subf %101, %117 : vector<16x32xf32>
    %cst_64 = arith.constant 9.99999996E-13 : f32
    %119 = vector.broadcast %cst_64 : f32 to vector<16x1xf32>
    %120 = arith.addf %116, %119 : vector<16x1xf32>
    %121 = math.rsqrt %120 : vector<16x1xf32>
    %122 = vector.broadcast %121 : vector<16x1xf32> to vector<16x32xf32>
    %123 = arith.mulf %118, %122 : vector<16x32xf32>
    %124 = vector.broadcast %102 : vector<1x32xf32> to vector<16x32xf32>
    %125 = arith.mulf %123, %124 : vector<16x32xf32>
    %126 = vector.broadcast %103 : vector<1x32xf32> to vector<16x32xf32>
    %127 = arith.addf %125, %126 : vector<16x32xf32>
    %c0_65 = arith.constant 0 : index
    %c0_66 = arith.constant 0 : index
    %c0_67 = arith.constant 0 : index
    %128 = vector.load %arg8[%c0_65, %c0_66, %c0_67] : memref<2x32x64xf32, #tpu.memory_space<vmem>>, vector<1x32x64xf32>
    %129 = vector.shape_cast %128 : vector<1x32x64xf32> to vector<32x64xf32>
    %cst_68 = arith.constant dense<0.000000e+00> : vector<16x64xf32>
    %130 = tpu.matmul %127, %129, %cst_68 {dimension_numbers = #tpu.dot_dimension_numbers<[1], [0], [0], [1], [0, 0, 1, 1], [], []>} : vector<16x32xf32>, vector<32x64xf32>, vector<16x64xf32> -> vector<16x64xf32>
    %131 = vector.extract_strided_slice %6 {offsets = [0, 0], sizes = [1, 64], strides = [1, 1]} : vector<2x64xf32> to vector<1x64xf32>
    %132 = vector.broadcast %131 : vector<1x64xf32> to vector<16x64xf32>
    %133 = arith.addf %130, %132 : vector<16x64xf32>
    %cst_69 = arith.constant 5.000000e-01 : f32
    %134 = vector.broadcast %cst_69 : f32 to vector<16x64xf32>
    %135 = arith.mulf %134, %133 : vector<16x64xf32>
    %cst_70 = arith.constant 4.471500e-02 : f32
    %136 = vector.broadcast %cst_70 : f32 to vector<16x64xf32>
    %137 = arith.mulf %136, %133 : vector<16x64xf32>
    %138 = arith.mulf %137, %133 : vector<16x64xf32>
    %139 = arith.mulf %138, %133 : vector<16x64xf32>
    %140 = arith.addf %133, %139 : vector<16x64xf32>
    %cst_71 = arith.constant 0.797884583 : f32
    %141 = vector.broadcast %cst_71 : f32 to vector<16x64xf32>
    %142 = arith.mulf %141, %140 : vector<16x64xf32>
    %143 = math.tanh %142 : vector<16x64xf32>
    %cst_72 = arith.constant 1.000000e+00 : f32
    %144 = vector.broadcast %cst_72 : f32 to vector<16x64xf32>
    %145 = arith.addf %144, %143 : vector<16x64xf32>
    %146 = arith.mulf %135, %145 : vector<16x64xf32>
    %c0_73 = arith.constant 0 : index
    %c0_74 = arith.constant 0 : index
    %c0_75 = arith.constant 0 : index
    %147 = vector.load %arg10[%c0_73, %c0_74, %c0_75] : memref<2x64x32xf32, #tpu.memory_space<vmem>>, vector<1x64x32xf32>
    %148 = vector.shape_cast %147 : vector<1x64x32xf32> to vector<64x32xf32>
    %cst_76 = arith.constant dense<0.000000e+00> : vector<16x32xf32>
    %149 = tpu.matmul %146, %148, %cst_76 {dimension_numbers = #tpu.dot_dimension_numbers<[1], [0], [0], [1], [0, 0, 1, 1], [], []>} : vector<16x64xf32>, vector<64x32xf32>, vector<16x32xf32> -> vector<16x32xf32>
    %150 = vector.extract_strided_slice %7 {offsets = [0, 0], sizes = [1, 32], strides = [1, 1]} : vector<2x32xf32> to vector<1x32xf32>
    %151 = vector.broadcast %150 : vector<1x32xf32> to vector<16x32xf32>
    %152 = arith.addf %149, %151 : vector<16x32xf32>
    %153 = arith.addf %127, %152 : vector<16x32xf32>
    %154 = vector.extract_strided_slice %8 {offsets = [0, 0], sizes = [1, 32], strides = [1, 1]} : vector<2x32xf32> to vector<1x32xf32>
    %155 = vector.extract_strided_slice %9 {offsets = [0, 0], sizes = [1, 32], strides = [1, 1]} : vector<2x32xf32> to vector<1x32xf32>
    %cst_77 = arith.constant dense<0.000000e+00> : vector<16xf32>
    %156 = vector.multi_reduction <add>, %153, %cst_77 [1] : vector<16x32xf32> to vector<16xf32>
    %157 = vector.shape_cast %156 : vector<16xf32> to vector<16x1xf32>
    %cst_78 = arith.constant 3.200000e+01 : f32
    %158 = vector.broadcast %cst_78 : f32 to vector<16x1xf32>
    %159 = arith.divf %157, %158 : vector<16x1xf32>
    %160 = vector.broadcast %159 : vector<16x1xf32> to vector<16x32xf32>
    %161 = arith.subf %153, %160 : vector<16x32xf32>
    %162 = vector.broadcast %159 : vector<16x1xf32> to vector<16x32xf32>
    %163 = arith.subf %153, %162 : vector<16x32xf32>
    %164 = arith.mulf %161, %163 : vector<16x32xf32>
    %cst_79 = arith.constant dense<0.000000e+00> : vector<16xf32>
    %165 = vector.multi_reduction <add>, %164, %cst_79 [1] : vector<16x32xf32> to vector<16xf32>
    %166 = vector.shape_cast %165 : vector<16xf32> to vector<16x1xf32>
    %cst_80 = arith.constant 3.200000e+01 : f32
    %167 = vector.broadcast %cst_80 : f32 to vector<16x1xf32>
    %168 = arith.divf %166, %167 : vector<16x1xf32>
    %169 = vector.broadcast %159 : vector<16x1xf32> to vector<16x32xf32>
    %170 = arith.subf %153, %169 : vector<16x32xf32>
    %cst_81 = arith.constant 9.99999996E-13 : f32
    %171 = vector.broadcast %cst_81 : f32 to vector<16x1xf32>
    %172 = arith.addf %168, %171 : vector<16x1xf32>
    %173 = math.rsqrt %172 : vector<16x1xf32>
    %174 = vector.broadcast %173 : vector<16x1xf32> to vector<16x32xf32>
    %175 = arith.mulf %170, %174 : vector<16x32xf32>
    %176 = vector.broadcast %154 : vector<1x32xf32> to vector<16x32xf32>
    %177 = arith.mulf %175, %176 : vector<16x32xf32>
    %178 = vector.broadcast %155 : vector<1x32xf32> to vector<16x32xf32>
    %179 = arith.addf %177, %178 : vector<16x32xf32>
    %c1 = arith.constant 1 : index
    %c0_82 = arith.constant 0 : index
    %c0_83 = arith.constant 0 : index
    %180 = vector.load %arg2[%c1, %c0_82, %c0_83] : memref<2x32x96xf32, #tpu.memory_space<vmem>>, vector<1x32x96xf32>
    %181 = vector.shape_cast %180 : vector<1x32x96xf32> to vector<32x96xf32>
    %cst_84 = arith.constant dense<0.000000e+00> : vector<16x96xf32>
    %182 = tpu.matmul %179, %181, %cst_84 {dimension_numbers = #tpu.dot_dimension_numbers<[1], [0], [0], [1], [0, 0, 1, 1], [], []>} : vector<16x32xf32>, vector<32x96xf32>, vector<16x96xf32> -> vector<16x96xf32>
    %183 = vector.extract_strided_slice %2 {offsets = [1, 0], sizes = [1, 96], strides = [1, 1]} : vector<2x96xf32> to vector<1x96xf32>
    %184 = vector.broadcast %183 : vector<1x96xf32> to vector<16x96xf32>
    %185 = arith.addf %182, %184 : vector<16x96xf32>
    %186 = vector.extract_strided_slice %185 {offsets = [0, 0], sizes = [16, 32], strides = [1, 1]} : vector<16x96xf32> to vector<16x32xf32>
    %cst_85 = arith.constant 0.353553385 : f32
    %187 = vector.broadcast %cst_85 : f32 to vector<16x32xf32>
    %188 = arith.mulf %186, %187 : vector<16x32xf32>
    %189 = vector.extract_strided_slice %185 {offsets = [0, 32], sizes = [16, 32], strides = [1, 1]} : vector<16x96xf32> to vector<16x32xf32>
    %190 = vector.extract_strided_slice %185 {offsets = [0, 64], sizes = [16, 32], strides = [1, 1]} : vector<16x96xf32> to vector<16x32xf32>
    %191 = tpu.transpose %189, [1, 0] : vector<16x32xf32> -> vector<32x16xf32>
    %192 = vector.extract_strided_slice %188 {offsets = [0, 0], sizes = [8, 32], strides = [1, 1]} : vector<16x32xf32> to vector<8x32xf32>
    %193 = vector.extract_strided_slice %192 {offsets = [0, 0], sizes = [8, 8], strides = [1, 1]} : vector<8x32xf32> to vector<8x8xf32>
    %194 = vector.extract_strided_slice %191 {offsets = [0, 0], sizes = [8, 8], strides = [1, 1]} : vector<32x16xf32> to vector<8x8xf32>
    %cst_86 = arith.constant dense<0.000000e+00> : vector<8x8xf32>
    %195 = tpu.matmul %193, %194, %cst_86 {dimension_numbers = #tpu.dot_dimension_numbers<[1], [0], [0], [1], [0, 0, 1, 1], [], []>} : vector<8x8xf32>, vector<8x8xf32>, vector<8x8xf32> -> vector<8x8xf32>
    %196 = vector.extract_strided_slice %192 {offsets = [0, 8], sizes = [8, 8], strides = [1, 1]} : vector<8x32xf32> to vector<8x8xf32>
    %197 = vector.extract_strided_slice %191 {offsets = [8, 0], sizes = [8, 8], strides = [1, 1]} : vector<32x16xf32> to vector<8x8xf32>
    %cst_87 = arith.constant dense<0.000000e+00> : vector<8x8xf32>
    %198 = tpu.matmul %196, %197, %cst_87 {dimension_numbers = #tpu.dot_dimension_numbers<[1], [0], [0], [1], [0, 0, 1, 1], [], []>} : vector<8x8xf32>, vector<8x8xf32>, vector<8x8xf32> -> vector<8x8xf32>
    %199 = vector.extract_strided_slice %192 {offsets = [0, 16], sizes = [8, 8], strides = [1, 1]} : vector<8x32xf32> to vector<8x8xf32>
    %200 = vector.extract_strided_slice %191 {offsets = [16, 0], sizes = [8, 8], strides = [1, 1]} : vector<32x16xf32> to vector<8x8xf32>
    %cst_88 = arith.constant dense<0.000000e+00> : vector<8x8xf32>
    %201 = tpu.matmul %199, %200, %cst_88 {dimension_numbers = #tpu.dot_dimension_numbers<[1], [0], [0], [1], [0, 0, 1, 1], [], []>} : vector<8x8xf32>, vector<8x8xf32>, vector<8x8xf32> -> vector<8x8xf32>
    %202 = vector.extract_strided_slice %192 {offsets = [0, 24], sizes = [8, 8], strides = [1, 1]} : vector<8x32xf32> to vector<8x8xf32>
    %203 = vector.extract_strided_slice %191 {offsets = [24, 0], sizes = [8, 8], strides = [1, 1]} : vector<32x16xf32> to vector<8x8xf32>
    %cst_89 = arith.constant dense<0.000000e+00> : vector<8x8xf32>
    %204 = tpu.matmul %202, %203, %cst_89 {dimension_numbers = #tpu.dot_dimension_numbers<[1], [0], [0], [1], [0, 0, 1, 1], [], []>} : vector<8x8xf32>, vector<8x8xf32>, vector<8x8xf32> -> vector<8x8xf32>
    %205 = vector.extract_strided_slice %188 {offsets = [8, 0], sizes = [8, 32], strides = [1, 1]} : vector<16x32xf32> to vector<8x32xf32>
    %206 = vector.extract_strided_slice %205 {offsets = [0, 0], sizes = [8, 8], strides = [1, 1]} : vector<8x32xf32> to vector<8x8xf32>
    %207 = vector.extract_strided_slice %191 {offsets = [0, 8], sizes = [8, 8], strides = [1, 1]} : vector<32x16xf32> to vector<8x8xf32>
    %cst_90 = arith.constant dense<0.000000e+00> : vector<8x8xf32>
    %208 = tpu.matmul %206, %207, %cst_90 {dimension_numbers = #tpu.dot_dimension_numbers<[1], [0], [0], [1], [0, 0, 1, 1], [], []>} : vector<8x8xf32>, vector<8x8xf32>, vector<8x8xf32> -> vector<8x8xf32>
    %209 = vector.extract_strided_slice %205 {offsets = [0, 8], sizes = [8, 8], strides = [1, 1]} : vector<8x32xf32> to vector<8x8xf32>
    %210 = vector.extract_strided_slice %191 {offsets = [8, 8], sizes = [8, 8], strides = [1, 1]} : vector<32x16xf32> to vector<8x8xf32>
    %cst_91 = arith.constant dense<0.000000e+00> : vector<8x8xf32>
    %211 = tpu.matmul %209, %210, %cst_91 {dimension_numbers = #tpu.dot_dimension_numbers<[1], [0], [0], [1], [0, 0, 1, 1], [], []>} : vector<8x8xf32>, vector<8x8xf32>, vector<8x8xf32> -> vector<8x8xf32>
    %212 = vector.extract_strided_slice %205 {offsets = [0, 16], sizes = [8, 8], strides = [1, 1]} : vector<8x32xf32> to vector<8x8xf32>
    %213 = vector.extract_strided_slice %191 {offsets = [16, 8], sizes = [8, 8], strides = [1, 1]} : vector<32x16xf32> to vector<8x8xf32>
    %cst_92 = arith.constant dense<0.000000e+00> : vector<8x8xf32>
    %214 = tpu.matmul %212, %213, %cst_92 {dimension_numbers = #tpu.dot_dimension_numbers<[1], [0], [0], [1], [0, 0, 1, 1], [], []>} : vector<8x8xf32>, vector<8x8xf32>, vector<8x8xf32> -> vector<8x8xf32>
    %215 = vector.extract_strided_slice %205 {offsets = [0, 24], sizes = [8, 8], strides = [1, 1]} : vector<8x32xf32> to vector<8x8xf32>
    %216 = vector.extract_strided_slice %191 {offsets = [24, 8], sizes = [8, 8], strides = [1, 1]} : vector<32x16xf32> to vector<8x8xf32>
    %cst_93 = arith.constant dense<0.000000e+00> : vector<8x8xf32>
    %217 = tpu.matmul %215, %216, %cst_93 {dimension_numbers = #tpu.dot_dimension_numbers<[1], [0], [0], [1], [0, 0, 1, 1], [], []>} : vector<8x8xf32>, vector<8x8xf32>, vector<8x8xf32> -> vector<8x8xf32>
    %218 = tpu.concatenate %195, %198, %201, %204, %208, %211, %214, %217 in 0 : vector<8x8xf32>, vector<8x8xf32>, vector<8x8xf32>, vector<8x8xf32>, vector<8x8xf32>, vector<8x8xf32>, vector<8x8xf32>, vector<8x8xf32> -> vector<64x8xf32>
    %219 = arith.addf %218, %1 : vector<64x8xf32>
    %cst_94 = arith.constant dense<0xFF800000> : vector<64xf32>
    %220 = vector.multi_reduction <maximumf>, %219, %cst_94 [1] : vector<64x8xf32> to vector<64xf32>
    %221 = vector.shape_cast %220 : vector<64xf32> to vector<64x1xf32>
    %222 = vector.broadcast %221 : vector<64x1xf32> to vector<64x8xf32>
    %223 = arith.subf %219, %222 : vector<64x8xf32>
    %224 = math.exp %223 : vector<64x8xf32>
    %cst_95 = arith.constant dense<0.000000e+00> : vector<64xf32>
    %225 = vector.multi_reduction <add>, %224, %cst_95 [1] : vector<64x8xf32> to vector<64xf32>
    %226 = vector.shape_cast %225 : vector<64xf32> to vector<64x1xf32>
    %227 = tpu.reciprocal %226 {approx = true} : vector<64x1xf32> -> vector<64x1xf32>
    %228 = vector.broadcast %227 : vector<64x1xf32> to vector<64x8xf32>
    %229 = arith.mulf %224, %228 : vector<64x8xf32>
    %230 = vector.extract_strided_slice %190 {offsets = [0, 0], sizes = [8, 32], strides = [1, 1]} : vector<16x32xf32> to vector<8x32xf32>
    %231 = vector.extract_strided_slice %229 {offsets = [0, 0], sizes = [8, 8], strides = [1, 1]} : vector<64x8xf32> to vector<8x8xf32>
    %232 = vector.extract_strided_slice %230 {offsets = [0, 0], sizes = [8, 8], strides = [1, 1]} : vector<8x32xf32> to vector<8x8xf32>
    %cst_96 = arith.constant dense<0.000000e+00> : vector<8x8xf32>
    %233 = tpu.matmul %231, %232, %cst_96 {dimension_numbers = #tpu.dot_dimension_numbers<[1], [0], [0], [1], [0, 0, 1, 1], [], []>} : vector<8x8xf32>, vector<8x8xf32>, vector<8x8xf32> -> vector<8x8xf32>
    %c0_97 = arith.constant 0 : index
    %c0_98 = arith.constant 0 : index
    %234 = vector.load %arg17[%c0_97, %c0_98] : memref<16x32xf32, #tpu.memory_space<vmem>>, vector<8x8xf32>
    tpu.vector_store %arg17[%c0_97, %c0_98], %233 {strides = array<i32>} : memref<16x32xf32, #tpu.memory_space<vmem>>, vector<8x8xf32>,
    %235 = vector.extract_strided_slice %229 {offsets = [8, 0], sizes = [8, 8], strides = [1, 1]} : vector<64x8xf32> to vector<8x8xf32>
    %236 = vector.extract_strided_slice %230 {offsets = [0, 8], sizes = [8, 8], strides = [1, 1]} : vector<8x32xf32> to vector<8x8xf32>
    %cst_99 = arith.constant dense<0.000000e+00> : vector<8x8xf32>
    %237 = tpu.matmul %235, %236, %cst_99 {dimension_numbers = #tpu.dot_dimension_numbers<[1], [0], [0], [1], [0, 0, 1, 1], [], []>} : vector<8x8xf32>, vector<8x8xf32>, vector<8x8xf32> -> vector<8x8xf32>
    %c0_100 = arith.constant 0 : index
    %c8_101 = arith.constant 8 : index
    %238 = vector.load %arg17[%c0_100, %c8_101] : memref<16x32xf32, #tpu.memory_space<vmem>>, vector<8x8xf32>
    tpu.vector_store %arg17[%c0_100, %c8_101], %237 {strides = array<i32>} : memref<16x32xf32, #tpu.memory_space<vmem>>, vector<8x8xf32>,
    %239 = vector.extract_strided_slice %229 {offsets = [16, 0], sizes = [8, 8], strides = [1, 1]} : vector<64x8xf32> to vector<8x8xf32>
    %240 = vector.extract_strided_slice %230 {offsets = [0, 16], sizes = [8, 8], strides = [1, 1]} : vector<8x32xf32> to vector<8x8xf32>
    %cst_102 = arith.constant dense<0.000000e+00> : vector<8x8xf32>
    %241 = tpu.matmul %239, %240, %cst_102 {dimension_numbers = #tpu.dot_dimension_numbers<[1], [0], [0], [1], [0, 0, 1, 1], [], []>} : vector<8x8xf32>, vector<8x8xf32>, vector<8x8xf32> -> vector<8x8xf32>
    %c0_103 = arith.constant 0 : index
    %c16_104 = arith.constant 16 : index
    %242 = vector.load %arg17[%c0_103, %c16_104] : memref<16x32xf32, #tpu.memory_space<vmem>>, vector<8x8xf32>
    tpu.vector_store %arg17[%c0_103, %c16_104], %241 {strides = array<i32>} : memref<16x32xf32, #tpu.memory_space<vmem>>, vector<8x8xf32>,
    %243 = vector.extract_strided_slice %229 {offsets = [24, 0], sizes = [8, 8], strides = [1, 1]} : vector<64x8xf32> to vector<8x8xf32>
    %244 = vector.extract_strided_slice %230 {offsets = [0, 24], sizes = [8, 8], strides = [1, 1]} : vector<8x32xf32> to vector<8x8xf32>
    %cst_105 = arith.constant dense<0.000000e+00> : vector<8x8xf32>
    %245 = tpu.matmul %243, %244, %cst_105 {dimension_numbers = #tpu.dot_dimension_numbers<[1], [0], [0], [1], [0, 0, 1, 1], [], []>} : vector<8x8xf32>, vector<8x8xf32>, vector<8x8xf32> -> vector<8x8xf32>
    %c0_106 = arith.constant 0 : index
    %c24_107 = arith.constant 24 : index
    %246 = vector.load %arg17[%c0_106, %c24_107] : memref<16x32xf32, #tpu.memory_space<vmem>>, vector<8x8xf32>
    tpu.vector_store %arg17[%c0_106, %c24_107], %245 {strides = array<i32>} : memref<16x32xf32, #tpu.memory_space<vmem>>, vector<8x8xf32>,
    %247 = vector.extract_strided_slice %190 {offsets = [8, 0], sizes = [8, 32], strides = [1, 1]} : vector<16x32xf32> to vector<8x32xf32>
    %248 = vector.extract_strided_slice %229 {offsets = [32, 0], sizes = [8, 8], strides = [1, 1]} : vector<64x8xf32> to vector<8x8xf32>
    %249 = vector.extract_strided_slice %247 {offsets = [0, 0], sizes = [8, 8], strides = [1, 1]} : vector<8x32xf32> to vector<8x8xf32>
    %cst_108 = arith.constant dense<0.000000e+00> : vector<8x8xf32>
    %250 = tpu.matmul %248, %249, %cst_108 {dimension_numbers = #tpu.dot_dimension_numbers<[1], [0], [0], [1], [0, 0, 1, 1], [], []>} : vector<8x8xf32>, vector<8x8xf32>, vector<8x8xf32> -> vector<8x8xf32>
    %c8_109 = arith.constant 8 : index
    %c0_110 = arith.constant 0 : index
    %251 = vector.load %arg17[%c8_109, %c0_110] : memref<16x32xf32, #tpu.memory_space<vmem>>, vector<8x8xf32>
    tpu.vector_store %arg17[%c8_109, %c0_110], %250 {strides = array<i32>} : memref<16x32xf32, #tpu.memory_space<vmem>>, vector<8x8xf32>,
    %252 = vector.extract_strided_slice %229 {offsets = [40, 0], sizes = [8, 8], strides = [1, 1]} : vector<64x8xf32> to vector<8x8xf32>
    %253 = vector.extract_strided_slice %247 {offsets = [0, 8], sizes = [8, 8], strides = [1, 1]} : vector<8x32xf32> to vector<8x8xf32>
    %cst_111 = arith.constant dense<0.000000e+00> : vector<8x8xf32>
    %254 = tpu.matmul %252, %253, %cst_111 {dimension_numbers = #tpu.dot_dimension_numbers<[1], [0], [0], [1], [0, 0, 1, 1], [], []>} : vector<8x8xf32>, vector<8x8xf32>, vector<8x8xf32> -> vector<8x8xf32>
    %c8_112 = arith.constant 8 : index
    %c8_113 = arith.constant 8 : index
    %255 = vector.load %arg17[%c8_112, %c8_113] : memref<16x32xf32, #tpu.memory_space<vmem>>, vector<8x8xf32>
    tpu.vector_store %arg17[%c8_112, %c8_113], %254 {strides = array<i32>} : memref<16x32xf32, #tpu.memory_space<vmem>>, vector<8x8xf32>,
    %256 = vector.extract_strided_slice %229 {offsets = [48, 0], sizes = [8, 8], strides = [1, 1]} : vector<64x8xf32> to vector<8x8xf32>
    %257 = vector.extract_strided_slice %247 {offsets = [0, 16], sizes = [8, 8], strides = [1, 1]} : vector<8x32xf32> to vector<8x8xf32>
    %cst_114 = arith.constant dense<0.000000e+00> : vector<8x8xf32>
    %258 = tpu.matmul %256, %257, %cst_114 {dimension_numbers = #tpu.dot_dimension_numbers<[1], [0], [0], [1], [0, 0, 1, 1], [], []>} : vector<8x8xf32>, vector<8x8xf32>, vector<8x8xf32> -> vector<8x8xf32>
    %c8_115 = arith.constant 8 : index
    %c16_116 = arith.constant 16 : index
    %259 = vector.load %arg17[%c8_115, %c16_116] : memref<16x32xf32, #tpu.memory_space<vmem>>, vector<8x8xf32>
    tpu.vector_store %arg17[%c8_115, %c16_116], %258 {strides = array<i32>} : memref<16x32xf32, #tpu.memory_space<vmem>>, vector<8x8xf32>,
    %260 = vector.extract_strided_slice %229 {offsets = [56, 0], sizes = [8, 8], strides = [1, 1]} : vector<64x8xf32> to vector<8x8xf32>
    %261 = vector.extract_strided_slice %247 {offsets = [0, 24], sizes = [8, 8], strides = [1, 1]} : vector<8x32xf32> to vector<8x8xf32>
    %cst_117 = arith.constant dense<0.000000e+00> : vector<8x8xf32>
    %262 = tpu.matmul %260, %261, %cst_117 {dimension_numbers = #tpu.dot_dimension_numbers<[1], [0], [0], [1], [0, 0, 1, 1], [], []>} : vector<8x8xf32>, vector<8x8xf32>, vector<8x8xf32> -> vector<8x8xf32>
    %c8_118 = arith.constant 8 : index
    %c24_119 = arith.constant 24 : index
    %263 = vector.load %arg17[%c8_118, %c24_119] : memref<16x32xf32, #tpu.memory_space<vmem>>, vector<8x8xf32>
    tpu.vector_store %arg17[%c8_118, %c24_119], %262 {strides = array<i32>} : memref<16x32xf32, #tpu.memory_space<vmem>>, vector<8x8xf32>,
    %c0_120 = arith.constant 0 : index
    %c0_121 = arith.constant 0 : index
    %264 = vector.load %arg17[%c0_120, %c0_121] : memref<16x32xf32, #tpu.memory_space<vmem>>, vector<16x32xf32>
    %c1_122 = arith.constant 1 : index
    %c0_123 = arith.constant 0 : index
    %c0_124 = arith.constant 0 : index
    %265 = vector.load %arg4[%c1_122, %c0_123, %c0_124] : memref<2x32x32xf32, #tpu.memory_space<vmem>>, vector<1x32x32xf32>
    %266 = vector.shape_cast %265 : vector<1x32x32xf32> to vector<32x32xf32>
    %cst_125 = arith.constant dense<0.000000e+00> : vector<16x32xf32>
    %267 = tpu.matmul %264, %266, %cst_125 {dimension_numbers = #tpu.dot_dimension_numbers<[1], [0], [0], [1], [0, 0, 1, 1], [], []>} : vector<16x32xf32>, vector<32x32xf32>, vector<16x32xf32> -> vector<16x32xf32>
    %268 = vector.extract_strided_slice %3 {offsets = [1, 0], sizes = [1, 32], strides = [1, 1]} : vector<2x32xf32> to vector<1x32xf32>
    %269 = vector.broadcast %268 : vector<1x32xf32> to vector<16x32xf32>
    %270 = arith.addf %267, %269 : vector<16x32xf32>
    %271 = arith.addf %179, %270 : vector<16x32xf32>
    %272 = vector.extract_strided_slice %4 {offsets = [1, 0], sizes = [1, 32], strides = [1, 1]} : vector<2x32xf32> to vector<1x32xf32>
    %273 = vector.extract_strided_slice %5 {offsets = [1, 0], sizes = [1, 32], strides = [1, 1]} : vector<2x32xf32> to vector<1x32xf32>
    %cst_126 = arith.constant dense<0.000000e+00> : vector<16xf32>
    %274 = vector.multi_reduction <add>, %271, %cst_126 [1] : vector<16x32xf32> to vector<16xf32>
    %275 = vector.shape_cast %274 : vector<16xf32> to vector<16x1xf32>
    %cst_127 = arith.constant 3.200000e+01 : f32
    %276 = vector.broadcast %cst_127 : f32 to vector<16x1xf32>
    %277 = arith.divf %275, %276 : vector<16x1xf32>
    %278 = vector.broadcast %277 : vector<16x1xf32> to vector<16x32xf32>
    %279 = arith.subf %271, %278 : vector<16x32xf32>
    %280 = vector.broadcast %277 : vector<16x1xf32> to vector<16x32xf32>
    %281 = arith.subf %271, %280 : vector<16x32xf32>
    %282 = arith.mulf %279, %281 : vector<16x32xf32>
    %cst_128 = arith.constant dense<0.000000e+00> : vector<16xf32>
    %283 = vector.multi_reduction <add>, %282, %cst_128 [1] : vector<16x32xf32> to vector<16xf32>
    %284 = vector.shape_cast %283 : vector<16xf32> to vector<16x1xf32>
    %cst_129 = arith.constant 3.200000e+01 : f32
    %285 = vector.broadcast %cst_129 : f32 to vector<16x1xf32>
    %286 = arith.divf %284, %285 : vector<16x1xf32>
    %287 = vector.broadcast %277 : vector<16x1xf32> to vector<16x32xf32>
    %288 = arith.subf %271, %287 : vector<16x32xf32>
    %cst_130 = arith.constant 9.99999996E-13 : f32
    %289 = vector.broadcast %cst_130 : f32 to vector<16x1xf32>
    %290 = arith.addf %286, %289 : vector<16x1xf32>
    %291 = math.rsqrt %290 : vector<16x1xf32>
    %292 = vector.broadcast %291 : vector<16x1xf32> to vector<16x32xf32>
    %293 = arith.mulf %288, %292 : vector<16x32xf32>
    %294 = vector.broadcast %272 : vector<1x32xf32> to vector<16x32xf32>
    %295 = arith.mulf %293, %294 : vector<16x32xf32>
    %296 = vector.broadcast %273 : vector<1x32xf32> to vector<16x32xf32>
    %297 = arith.addf %295, %296 : vector<16x32xf32>
    %c1_131 = arith.constant 1 : index
    %c0_132 = arith.constant 0 : index
    %c0_133 = arith.constant 0 : index
    %298 = vector.load %arg8[%c1_131, %c0_132, %c0_133] : memref<2x32x64xf32, #tpu.memory_space<vmem>>, vector<1x32x64xf32>
    %299 = vector.shape_cast %298 : vector<1x32x64xf32> to vector<32x64xf32>
    %cst_134 = arith.constant dense<0.000000e+00> : vector<16x64xf32>
    %300 = tpu.matmul %297, %299, %cst_134 {dimension_numbers = #tpu.dot_dimension_numbers<[1], [0], [0], [1], [0, 0, 1, 1], [], []>} : vector<16x32xf32>, vector<32x64xf32>, vector<16x64xf32> -> vector<16x64xf32>
    %301 = vector.extract_strided_slice %6 {offsets = [1, 0], sizes = [1, 64], strides = [1, 1]} : vector<2x64xf32> to vector<1x64xf32>
    %302 = vector.broadcast %301 : vector<1x64xf32> to vector<16x64xf32>
    %303 = arith.addf %300, %302 : vector<16x64xf32>
    %cst_135 = arith.constant 5.000000e-01 : f32
    %304 = vector.broadcast %cst_135 : f32 to vector<16x64xf32>
    %305 = arith.mulf %304, %303 : vector<16x64xf32>
    %cst_136 = arith.constant 4.471500e-02 : f32
    %306 = vector.broadcast %cst_136 : f32 to vector<16x64xf32>
    %307 = arith.mulf %306, %303 : vector<16x64xf32>
    %308 = arith.mulf %307, %303 : vector<16x64xf32>
    %309 = arith.mulf %308, %303 : vector<16x64xf32>
    %310 = arith.addf %303, %309 : vector<16x64xf32>
    %cst_137 = arith.constant 0.797884583 : f32
    %311 = vector.broadcast %cst_137 : f32 to vector<16x64xf32>
    %312 = arith.mulf %311, %310 : vector<16x64xf32>
    %313 = math.tanh %312 : vector<16x64xf32>
    %cst_138 = arith.constant 1.000000e+00 : f32
    %314 = vector.broadcast %cst_138 : f32 to vector<16x64xf32>
    %315 = arith.addf %314, %313 : vector<16x64xf32>
    %316 = arith.mulf %305, %315 : vector<16x64xf32>
    %c1_139 = arith.constant 1 : index
    %c0_140 = arith.constant 0 : index
    %c0_141 = arith.constant 0 : index
    %317 = vector.load %arg10[%c1_139, %c0_140, %c0_141] : memref<2x64x32xf32, #tpu.memory_space<vmem>>, vector<1x64x32xf32>
    %318 = vector.shape_cast %317 : vector<1x64x32xf32> to vector<64x32xf32>
    %cst_142 = arith.constant dense<0.000000e+00> : vector<16x32xf32>
    %319 = tpu.matmul %316, %318, %cst_142 {dimension_numbers = #tpu.dot_dimension_numbers<[1], [0], [0], [1], [0, 0, 1, 1], [], []>} : vector<16x64xf32>, vector<64x32xf32>, vector<16x32xf32> -> vector<16x32xf32>
    %320 = vector.extract_strided_slice %7 {offsets = [1, 0], sizes = [1, 32], strides = [1, 1]} : vector<2x32xf32> to vector<1x32xf32>
    %321 = vector.broadcast %320 : vector<1x32xf32> to vector<16x32xf32>
    %322 = arith.addf %319, %321 : vector<16x32xf32>
    %323 = arith.addf %297, %322 : vector<16x32xf32>
    %324 = vector.extract_strided_slice %8 {offsets = [1, 0], sizes = [1, 32], strides = [1, 1]} : vector<2x32xf32> to vector<1x32xf32>
    %325 = vector.extract_strided_slice %9 {offsets = [1, 0], sizes = [1, 32], strides = [1, 1]} : vector<2x32xf32> to vector<1x32xf32>
    %cst_143 = arith.constant dense<0.000000e+00> : vector<16xf32>
    %326 = vector.multi_reduction <add>, %323, %cst_143 [1] : vector<16x32xf32> to vector<16xf32>
    %327 = vector.shape_cast %326 : vector<16xf32> to vector<16x1xf32>
    %cst_144 = arith.constant 3.200000e+01 : f32
    %328 = vector.broadcast %cst_144 : f32 to vector<16x1xf32>
    %329 = arith.divf %327, %328 : vector<16x1xf32>
    %330 = vector.broadcast %329 : vector<16x1xf32> to vector<16x32xf32>
    %331 = arith.subf %323, %330 : vector<16x32xf32>
    %332 = vector.broadcast %329 : vector<16x1xf32> to vector<16x32xf32>
    %333 = arith.subf %323, %332 : vector<16x32xf32>
    %334 = arith.mulf %331, %333 : vector<16x32xf32>
    %cst_145 = arith.constant dense<0.000000e+00> : vector<16xf32>
    %335 = vector.multi_reduction <add>, %334, %cst_145 [1] : vector<16x32xf32> to vector<16xf32>
    %336 = vector.shape_cast %335 : vector<16xf32> to vector<16x1xf32>
    %cst_146 = arith.constant 3.200000e+01 : f32
    %337 = vector.broadcast %cst_146 : f32 to vector<16x1xf32>
    %338 = arith.divf %336, %337 : vector<16x1xf32>
    %339 = vector.broadcast %329 : vector<16x1xf32> to vector<16x32xf32>
    %340 = arith.subf %323, %339 : vector<16x32xf32>
    %cst_147 = arith.constant 9.99999996E-13 : f32
    %341 = vector.broadcast %cst_147 : f32 to vector<16x1xf32>
    %342 = arith.addf %338, %341 : vector<16x1xf32>
    %343 = math.rsqrt %342 : vector<16x1xf32>
    %344 = vector.broadcast %343 : vector<16x1xf32> to vector<16x32xf32>
    %345 = arith.mulf %340, %344 : vector<16x32xf32>
    %346 = vector.broadcast %324 : vector<1x32xf32> to vector<16x32xf32>
    %347 = arith.mulf %345, %346 : vector<16x32xf32>
    %348 = vector.broadcast %325 : vector<1x32xf32> to vector<16x32xf32>
    %349 = arith.addf %347, %348 : vector<16x32xf32>
    %c0_148 = arith.constant 0 : index
    %c0_149 = arith.constant 0 : index
    %350 = vector.load %arg14[%c0_148, %c0_149] : memref<1x32xf32, #tpu.memory_space<vmem>>, vector<1x32xf32>
    %c0_150 = arith.constant 0 : index
    %c0_151 = arith.constant 0 : index
    %351 = vector.load %arg15[%c0_150, %c0_151] : memref<1x1xf32, #tpu.memory_space<vmem>>, vector<1x1xf32>
    %352 = vector.broadcast %350 : vector<1x32xf32> to vector<16x32xf32>
    %353 = arith.mulf %349, %352 : vector<16x32xf32>
    %cst_152 = arith.constant dense<0.000000e+00> : vector<16xf32>
    %354 = vector.multi_reduction <add>, %353, %cst_152 [1] : vector<16x32xf32> to vector<16xf32>
    %355 = vector.shape_cast %354 : vector<16xf32> to vector<16x1xf32>
    %356 = vector.broadcast %351 : vector<1x1xf32> to vector<16x1xf32>
    %357 = arith.addf %355, %356 : vector<16x1xf32>
    %c0_153 = arith.constant 0 : index
    %c0_154 = arith.constant 0 : index
    %358 = vector.load %arg16[%c0_153, %c0_154] : memref<16x1xf32, #tpu.memory_space<vmem>>, vector<16x1xf32>
    tpu.vector_store %arg16[%c0_153, %c0_154], %357 {strides = array<i32>} : memref<16x1xf32, #tpu.memory_space<vmem>>, vector<16x1xf32>,
    return
  }
}

</mosaic_0001>

<bundles_post_ra>
// kernel: ptm_forward.1
= control target key start
LH: loop header
LB: loop body
LE: loop exit
PB: predicated region body
PF: predicated region fallthrough
CT: control target
= control target key end

     0   :  { %vm81_vm0 = vcmask 261120   ;;  %v77_v8 = vlaneseq  ;;  %v4413_v10 = vmov 0.0   ;;  %vm4414_vm1 = vmmov 0   ;;  %s4417_s21 = smov 80   ;;  %s4418_s22 = smov 120   ;;  %s5146_s2 = inlined_call_operand.vmem [shape: f32[2,32,96], index: 2, kind: input, shape index: {}]   ;;  %s5147_s0 = inlined_call_operand.vmem [shape: f32[16,32], index: 0, kind: input, shape index: {}]   ;;  %s5148_s3 = inlined_call_operand.vmem [shape: f32[2,96], index: 3, kind: input, shape index: {}]   ;;  %s5149_s1 = inlined_call_operand.vmem [shape: f32[64,8], index: 1, kind: input, shape index: {}]   ;;  %s5150_s4 = inlined_call_operand.vmem [shape: f32[2,32,32], index: 4, kind: input, shape index: {}]   ;;  %s5151_s5 = inlined_call_operand.vmem [shape: f32[2,32], index: 5, kind: input, shape index: {}]   ;;  %s5152_s8 = inlined_call_operand.vmem [shape: f32[2,32,64], index: 8, kind: input, shape index: {}]   ;;  %s5153_s6 = inlined_call_operand.vmem [shape: f32[2,32], index: 6, kind: input, shape index: {}]   ;;  %s5154_s7 = inlined_call_operand.vmem [shape: f32[2,32], index: 7, kind: input, shape index: {}]   ;;  %s5155_s10 = inlined_call_operand.vmem [shape: f32[2,64,32], index: 10, kind: input, shape index: {}]   ;;  %s5156_s9 = inlined_call_operand.vmem [shape: f32[2,64], index: 9, kind: input, shape index: {}]   ;;  %s5157_s11 = inlined_call_operand.vmem [shape: f32[2,32], index: 11, kind: input, shape index: {}]   ;;  %s5158_s12 = inlined_call_operand.vmem [shape: f32[2,32], index: 12, kind: input, shape index: {}]   ;;  %s5159_s13 = inlined_call_operand.vmem [shape: f32[2,32], index: 13, kind: input, shape index: {}]   ;;  %s5160_s15 = inlined_call_operand.<no memory space> [shape: f32[1,1], index: 15, kind: input, shape index: {}]   ;;  %s5161_s14 = inlined_call_operand.vmem [shape: f32[1,32], index: 14, kind: input, shape index: {}]   ;;  %s5162_s16 = inlined_call_operand.vmem [shape: f32[16,1], index: 16, kind: output, shape index: {}]  }
   0x1   :  { %5172 = sst [smem:[#allocation4_spill]] %s5146_s2  ;;  %v4529_v5 = vld [vmem:[%s5147_s0] sm:$0xff]  ;;  %v4536_v7 = vld [vmem:[%s5147_s0 + $0x8] sm:$0xff]  ;;  %3986 = vmatprep.subr.mxu0 %v4413_v10  ;;  %3988 = vmatprep.mubr.msk.f32.mxu0 %vm4414_vm1, %v4413_v10  ;;  %s4415_s0 = smov 88   ;;  %vm168_vm2 = vcmask 64512   ;;  %v4641_v40 = vld [vmem:[%s5149_s1 + $0x10] sm:$0xff] }
   0x2   :  { %s5173_s23 = sld [smem:[#allocation4_spill]]  ;;  %3973 = vmatprep.mubr.msk.f32.mxu1 %vm81_vm0, %v4529_v5  ;;  %v4540_v9 = vshrl.u32 %v77_v8, 7  ;;  %v4550_v12 = vld [vmem:[%s5148_s3] sm:$0x3]  ;;  %s4416_s3 = smov 96   ;;  %v4635_v38 = vld [vmem:[%s5149_s1 + $0x8] sm:$0xff] }
   0x3   :  { %s4419_s24 = smov 72   ;;  %s4420_s25 = smov 112   ;;  %v4629_v34 = vld [vmem:[%s5149_s1] sm:$0xff]  ;;  %v4654_v49 = vld [vmem:[%s5149_s1 + $0x18] sm:$0xff]  ;;  %v4662_v57 = vld [vmem:[%s5149_s1 + $0x28] sm:$0xff]  ;;  %vm1043_vm3 = vcmask 130112  }
   0x4   :  { %v4545_v11 = vsub.s32 0, %v4540_v9  ;;  %s4421_s26 = smov 104   ;;  %v4649_v48 = vld [vmem:[%s5149_s1 + $0x20] sm:$0xff]  ;;  %v4670_v63 = vld [vmem:[%s5149_s1 + $0x30] sm:$0xff]  ;;  %s5170_s19 = smov 64   ;;  %vm1125_vm4 = vcmask 195712  }
   0x5   :  { %s5164_s20 = smov 56   ;;  %s5166_s27 = smov 40   ;;  %vm1207_vm5 = vcmask 261312   ;;  %vm1780_vm6 = vcmask 523264   ;;  %vm3752_vm7 = vcmask 7168  }
   0x6   :  { %v80_v13 = vrot.slane %v4550_v12, %v4545_v11  ;;  %s4426_s28 = smov 8   ;;  %s4427_s18 = smov 16  }
   0x7   :  { %s4428_s29 = smov 24  }
   0x8   :  { %v73_v0 = vld [vmem:[%s5173_s23] sm:$0xff]  ;;  %v74_v1 = vld [vmem:[%s5173_s23 + $0x8] sm:$0xff]  ;;  %v75_v2 = vld [vmem:[%s5173_s23 + $0x10] sm:$0xff] }
   0x9   :  { %v4229_v3 = vpack.c.bf16 %v74_v1, %v73_v0  ;;  %v76_v4 = vld [vmem:[%s5173_s23 + $0x18] sm:$0xff] }
   0xa   :  { %v4233_v6 = vpack.c.bf16 %v76_v4, %v75_v2  ;;  %v4675_v0 = vld [vmem:[%s5149_s1 + $0x38] sm:$0xff]  ;;  %s5168_s1 = smov 48  }
   0xb   :  { %4230 = vmatprep.subr.bf16.mxu1 %v4229_v3 }
   0xc   :  { %4232 = vmatpush3.bf16.msra.mxu1 %v4229_v3 }
   0xd   :  { %4234 = vmatprep.subr.bf16.mxu1 %v4233_v6 }
  0x10   :  { %4236 = vmatpush3.bf16.msra.mxu1 %v4233_v6 }
  0x11   :  { %3976 = vmatprep.subr.mxu1 %v4413_v10 }
  0x13   :  { %3974 = vmatmul.mubr.msk.f32.vlgmr.msra.gmra.mrb[0].mxu1 %vm81_vm0, %v4536_v7 }
  0x14   :  { %3978 = vmatprep.mubr.msk.f32.mxu1 %vm4414_vm1, %v4413_v10 }
  0xe6   :  { %v3975_v14 = vpop.f32.mrb[0].mxu1 }
  0xe7   :  { %v4558_v15 = vadd.f32 %v3975_v14, %v80_v13  ;;  %v154_v16 = vpop.f32.mrb[1].mxu1 }
  0xe8   :  { %v4564_v17 = vadd.f32 %v154_v16, %v80_v13 }
  0xe9   :  { %558 = vrot.lane.b32.xlu0 %v4558_v15, %s4415_s0  ;;  %479 = vrot.lane.b32.xlu1 %v4558_v15, %s4416_s3  ;;  %v164_v19 = vmul.f32 0.35355338, %v4558_v15 }
  0xea   :  { %v163_v18 = vmul.f32 0.35355338, %v4564_v17 }
  0xed   :  { %324 = vrot.lane.b32.xlu1 %v4564_v17, %s4417_s21  ;;  %166 = vrot.lane.b32.xlu0 %v4564_v17, %s4416_s3 }
  0xf1   :  { %246 = vrot.lane.b32.xlu0 %v4564_v17, %s4415_s0  ;;  %244 = vrot.lane.b32.xlu1 %v163_v18, %s4418_s22 }
  0xf5   :  { %402 = vrot.lane.b32.xlu0 %v4564_v17, %s4419_s24  ;;  %322 = vrot.lane.b32.xlu1 %v163_v18, %s4420_s25 }
  0xf9   :  { %400 = vrot.lane.b32.xlu0 %v163_v18, %s4421_s26  ;;  %556 = vrot.lane.b32.xlu1 %v164_v19, %s4418_s22 }
  0xfd   :  { %636 = vrot.lane.b32.xlu0 %v4558_v15, %s4417_s21  ;;  %714 = vrot.lane.b32.xlu1 %v4558_v15, %s4419_s24 }
 0x101   :  { %634 = vrot.lane.b32.xlu0 %v164_v19, %s4420_s25  ;;  %712 = vrot.lane.b32.xlu1 %v164_v19, %s4421_s26 }
 0x15b   :  { %v559_v20 = vpop.permute.xlu0 %558  ;;  %v480_v21 = vpop.permute.xlu1 %479 }
 0x15f   :  { %v325_v22 = vpop.permute.xlu1 %324  ;;  %v167_v23 = vpop.permute.xlu0 %166 }
 0x160   :  { %3977 = vmatpush3.xpose.msk.msra.mxu1 %vm168_vm2, %v167_v23  ;;  %3987 = vmatpush3.xpose.msk.msra.mxu0 %vm168_vm2, %v325_v22 }
 0x161   :  { %3981 = vmatprep.subr.mxu1 %v4413_v10  ;;  %3996 = vmatprep.subr.mxu0 %v4413_v10 }
 0x163   :  { %v247_v24 = vpop.permute.xlu0 %246  ;;  %v245_v25 = vpop.permute.xlu1 %244  ;;  %3979 = vmatmul.mubr.msk.f32.vlgmr.msra.gmra.mrb[2].mxu1 %vm168_vm2, %v163_v18 }
 0x164   :  { %3982 = vmatpush3.xpose.msk.msra.mxu1 %vm168_vm2, %v247_v24  ;;  %3983 = vmatprep.mubr.msk.f32.mxu1 %vm4414_vm1, %v4413_v10 }
 0x165   :  { %3991 = vmatprep.subr.mxu1 %v4413_v10 }
 0x167   :  { %v403_v26 = vpop.permute.xlu0 %402  ;;  %v323_v27 = vpop.permute.xlu1 %322  ;;  %3984 = vmatmul.mubr.msk.f32.vlgmr.msra.gmra.mrb[4].mxu1 %vm168_vm2, %v245_v25 }
 0x168   :  { %3989 = vmatmul.mubr.msk.f32.vlgmr.msra.gmra.mrb[0].mxu0 %vm168_vm2, %v323_v27  ;;  %3992 = vmatpush3.xpose.msk.msra.mxu1 %vm168_vm2, %v403_v26 }
 0x169   :  { %3997 = vmatpush3.xpose.msk.msra.mxu0 %vm168_vm2, %v480_v21  ;;  %3998 = vmatprep.mubr.msk.f32.mxu0 %vm4414_vm1, %v4413_v10 }
 0x16a   :  { %3993 = vmatprep.mubr.msk.f32.mxu1 %vm4414_vm1, %v4413_v10  ;;  %4001 = vmatprep.subr.mxu1 %v4413_v10 }
 0x16b   :  { %v401_v28 = vpop.permute.xlu0 %400  ;;  %v557_v29 = vpop.permute.xlu1 %556  ;;  %4006 = vmatprep.subr.mxu0 %v4413_v10 }
 0x16c   :  { %3994 = vmatmul.mubr.msk.f32.vlgmr.msra.gmra.mrb[6].mxu1 %vm168_vm2, %v401_v28  ;;  %3999 = vmatmul.mubr.msk.f32.vlgmr.msra.gmra.mrb[2].mxu0 %vm168_vm2, %v164_v19 }
 0x16d   :  { %4002 = vmatpush3.xpose.msk.msra.mxu1 %vm168_vm2, %v559_v20  ;;  %4003 = vmatprep.mubr.msk.f32.mxu1 %vm4414_vm1, %v4413_v10 }
 0x16e   :  { %4011 = vmatprep.subr.mxu1 %v4413_v10  ;;  %4008 = vmatprep.mubr.msk.f32.mxu0 %vm4414_vm1, %v4413_v10 }
 0x16f   :  { %v637_v30 = vpop.permute.xlu0 %636  ;;  %v715_v31 = vpop.permute.xlu1 %714 }
 0x170   :  { %4004 = vmatmul.mubr.msk.f32.vlgmr.msra.gmra.mrb[8].mxu1 %vm168_vm2, %v557_v29  ;;  %4007 = vmatpush3.xpose.msk.msra.mxu0 %vm168_vm2, %v637_v30 }
 0x171   :  { %4012 = vmatpush3.xpose.msk.msra.mxu1 %vm168_vm2, %v715_v31  ;;  %4013 = vmatprep.mubr.msk.f32.mxu1 %vm4414_vm1, %v4413_v10 }
 0x172   :  { %4016 = vmatprep.subr.mxu0 %v4413_v10  ;;  %4021 = vmatprep.subr.mxu1 %v4413_v10 }
 0x173   :  { %v635_v32 = vpop.permute.xlu0 %634  ;;  %v713_v33 = vpop.permute.xlu1 %712 }
 0x174   :  { %4009 = vmatmul.mubr.msk.f32.vlgmr.msra.gmra.mrb[4].mxu0 %vm168_vm2, %v635_v32  ;;  %4014 = vmatmul.mubr.msk.f32.vlgmr.msra.gmra.mrb[10].mxu1 %vm168_vm2, %v713_v33 }
 0x175   :  { %4018 = vmatprep.mubr.msk.f32.mxu0 %vm4414_vm1, %v4413_v10  ;;  %4023 = vmatprep.mubr.msk.f32.mxu1 %vm4414_vm1, %v4413_v10 }
 0x236   :  { %v240_v35 = vpop.f32.mrb[2].mxu1 }
 0x237   :  { %v790_v36 = vadd.f32 %v240_v35, %v4629_v34  ;;  %v3980_v37 = vpop.f32.mrb[3].mxu1 }
 0x239   :  { %v798_v39 = vsel %vm168_vm2, %v790_v36, -inf }
 0x23a   :  { %799 = vmax.xlane.f32.xlu0 %v798_v39  ;;  %v318_v41 = vpop.f32.mrb[4].mxu1 }
 0x23b   :  { %v791_v42 = vadd.f32 %v318_v41, %v4635_v38  ;;  %v3985_v43 = vpop.f32.mrb[5].mxu1  ;;  %v396_v44 = vpop.f32.mrb[0].mxu0 }
 0x23c   :  { %v792_v45 = vadd.f32 %v396_v44, %v4641_v40  ;;  %v3990_v46 = vpop.f32.mrb[1].mxu0 }
 0x23d   :  { %v801_v47 = vsel %vm168_vm2, %v791_v42, -inf }
 0x23e   :  { %802 = vmax.xlane.f32.xlu1 %v801_v47  ;;  %v804_v50 = vsel %vm168_vm2, %v792_v45, -inf }
 0x23f   :  { %v552_v51 = vpop.f32.mrb[2].mxu0  ;;  %805 = vmax.xlane.f32.xlu0 %v804_v50  ;;  %v474_v52 = vpop.f32.mrb[6].mxu1 }
 0x240   :  { %v794_v53 = vadd.f32 %v552_v51, %v4649_v48  ;;  %v793_v54 = vadd.f32 %v474_v52, %v4654_v49  ;;  %v3995_v55 = vpop.f32.mrb[7].mxu1  ;;  %v4000_v56 = vpop.f32.mrb[3].mxu0 }
 0x242   :  { %v810_v58 = vsel %vm168_vm2, %v794_v53, -inf  ;;  %v807_v59 = vsel %vm168_vm2, %v793_v54, -inf }
 0x243   :  { %811 = vmax.xlane.f32.xlu1 %v810_v58  ;;  %808 = vmax.xlane.f32.xlu0 %v807_v59  ;;  %v630_v60 = vpop.f32.mrb[8].mxu1 }
 0x244   :  { %v795_v61 = vadd.f32 %v630_v60, %v4662_v57  ;;  %v4005_v62 = vpop.f32.mrb[9].mxu1 }
 0x246   :  { %v813_v1 = vsel %vm168_vm2, %v795_v61, -inf }
 0x247   :  { %v708_v2 = vpop.f32.mrb[4].mxu0  ;;  %814 = vmax.xlane.f32.xlu0 %v813_v1  ;;  %v786_v3 = vpop.f32.mrb[10].mxu1 }
 0x248   :  { %v796_v4 = vadd.f32 %v708_v2, %v4670_v63  ;;  %v797_v6 = vadd.f32 %v786_v3, %v4675_v0  ;;  %v4010_v8 = vpop.f32.mrb[5].mxu0  ;;  %v4015_v13 = vpop.f32.mrb[11].mxu1 }
 0x24a   :  { %v816_v14 = vsel %vm168_vm2, %v796_v4, -inf  ;;  %v819_v16 = vsel %vm168_vm2, %v797_v6, -inf }
 0x24b   :  { %817 = vmax.xlane.f32.xlu1 %v816_v14  ;;  %820 = vmax.xlane.f32.xlu0 %v819_v16 }
 0x25c   :  { %886 = vrot.lane.b32.xlu1 %v4564_v17, %s5170_s19 }
 0x260   :  { %1045 = vrot.lane.b32.xlu1 %v4564_v17, %s5168_s1 }
 0x261   :  { %963 = vrot.lane.b32.xlu0 %v4564_v17, %s5164_s20 }
 0x264   :  { %1127 = vrot.lane.b32.xlu1 %v4564_v17, %s5166_s27 }
 0x265   :  { %1209 = vrot.lane.b32.xlu0 %v4558_v15, %s5170_s19 }
 0x268   :  { %1286 = vrot.lane.b32.xlu1 %v4558_v15, %s5164_s20 }
 0x2c7   :  { %v800_v18 = vpop.xlane.xlu0 %799 }
 0x2c8   :  { %v822_v19 = vsub.f32 %v790_v36, %v800_v18 }
 0x2ca   :  { %v830_v20 = vmul.f32 1.442695, %v822_v19 }
 0x2cb   :  { %v803_v21 = vpop.xlane.xlu1 %802 }
 0x2cc   :  { %4325 = vpow2.f32 %v830_v20  ;;  %v823_v22 = vsub.f32 %v791_v42, %v803_v21  ;;  %v806_v23 = vpop.xlane.xlu0 %805 }
 0x2cd   :  { %v824_v24 = vsub.f32 %v792_v45, %v806_v23 }
 0x2ce   :  { %v832_v25 = vmul.f32 1.442695, %v823_v22 }
 0x2cf   :  { %v834_v26 = vmul.f32 1.442695, %v824_v24 }
 0x2d0   :  { %4327 = vpow2.f32 %v832_v25  ;;  %v812_v27 = vpop.xlane.xlu1 %811  ;;  %v809_v28 = vpop.xlane.xlu0 %808 }
 0x2d1   :  { %4329 = vpow2.f32 %v834_v26  ;;  %v826_v17 = vsub.f32 %v794_v53, %v812_v27  ;;  %v825_v29 = vsub.f32 %v793_v54, %v809_v28 }
 0x2d3   :  { %v838_v30 = vmul.f32 1.442695, %v826_v17  ;;  %v836_v31 = vmul.f32 1.442695, %v825_v29 }
 0x2d4   :  { %v815_v32 = vpop.xlane.xlu0 %814 }
 0x2d5   :  { %4331 = vpow2.f32 %v838_v30  ;;  %v827_v33 = vsub.f32 %v795_v61, %v815_v32 }
 0x2d6   :  { %v4326_v35 = vpop.eup %4325  ;;  %4333 = vpow2.f32 %v836_v31 }
 0x2d7   :  { %v840_v36 = vmul.f32 1.442695, %v827_v33  ;;  %v846_v37 = vsel %vm168_vm2, %v4326_v35, 0.0 }
 0x2d8   :  { %847 = vadd.xlane.f32.xlu1 %v846_v37  ;;  %v818_v39 = vpop.xlane.xlu1 %817  ;;  %v821_v41 = vpop.xlane.xlu0 %820 }
 0x2d9   :  { %4335 = vpow2.f32 %v840_v36  ;;  %v828_v42 = vsub.f32 %v796_v4, %v818_v39  ;;  %v829_v43 = vsub.f32 %v797_v6, %v821_v41 }
 0x2da   :  { %v4328_v44 = vpop.eup %4327 }
 0x2db   :  { %v4330_v45 = vpop.eup %4329  ;;  %v842_v46 = vmul.f32 1.442695, %v828_v42  ;;  %v844_v47 = vmul.f32 1.442695, %v829_v43  ;;  %v849_v50 = vsel %vm168_vm2, %v4328_v44, 0.0 }
 0x2dc   :  { %v887_v51 = vpop.permute.xlu1 %886  ;;  %850 = vadd.xlane.f32.xlu0 %v849_v50  ;;  %v964_v52 = vpop.permute.xlu0 %963  ;;  %v852_v53 = vsel %vm168_vm2, %v4330_v45, 0.0  ;;  %v1532_v50 = vld [vmem:[%s5150_s4 + $0x8] sm:$0xff] }
 0x2dd   :  { %4337 = vpow2.f32 %v842_v46  ;;  %853 = vadd.xlane.f32.xlu1 %v852_v53  ;;  %4017 = vmatpush3.msra.mxu0 %v887_v51  ;;  %v1533_v53 = vld [vmem:[%s5150_s4 + $0x10] sm:$0xff] }
 0x2de   :  { %4339 = vpow2.f32 %v844_v47  ;;  %4022 = vmatpush3.msra.mxu1 %v964_v52  ;;  %4026 = vmatprep.subr.mxu0 %v4413_v10  ;;  %v1531_v47 = vld [vmem:[%s5150_s4] sm:$0xff] }
 0x2df   :  { %v4332_v54 = vpop.eup %4331  ;;  %4031 = vmatprep.subr.mxu1 %v4413_v10  ;;  %v4237_v52 = vpack.c.bf16 %v1532_v50, %v1531_v47 }
 0x2e0   :  { %v4334_v55 = vpop.eup %4333  ;;  %v858_v56 = vsel %vm168_vm2, %v4332_v54, 0.0  ;;  %v1046_v3 = vpop.permute.xlu1 %1045 }
 0x2e1   :  { %859 = vadd.xlane.f32.xlu1 %v858_v56  ;;  %v855_v58 = vsel %vm168_vm2, %v4334_v55, 0.0  ;;  %v1210_v8 = vpop.permute.xlu0 %1209 }
 0x2e2   :  { %856 = vadd.xlane.f32.xlu0 %v855_v58 }
 0x2e3   :  { %v4336_v59 = vpop.eup %4335 }
 0x2e4   :  { %v861_v60 = vsel %vm168_vm2, %v4336_v59, 0.0  ;;  %v1128_v4 = vpop.permute.xlu1 %1127 }
 0x2e6   :  { %862 = vadd.xlane.f32.xlu0 %v861_v60 }
 0x2e7   :  { %v4702_v61 = vpop.eup %4337 }
 0x2e8   :  { %v4704_v62 = vpop.eup %4339  ;;  %v864_v1 = vsel %vm168_vm2, %v4702_v61, 0.0  ;;  %v1287_v6 = vpop.permute.xlu1 %1286 }
 0x2e9   :  { %865 = vadd.xlane.f32.xlu1 %v864_v1  ;;  %v867_v2 = vsel %vm168_vm2, %v4704_v62, 0.0 }
 0x2ea   :  { %868 = vadd.xlane.f32.xlu0 %v867_v2 }
 0x2fa   :  { %1448 = vrot.lane.b32.xlu1 %v4558_v15, %s5166_s27 }
 0x300   :  { %1367 = vrot.lane.b32.xlu0 %v4558_v15, %s5168_s1 }
 0x365   :  { %v848_v13 = vpop.xlane.xlu1 %847 }
 0x366   :  { %4341 = vrcp.f32 %v848_v13 }
 0x369   :  { %v851_v14 = vpop.xlane.xlu0 %850 }
 0x36a   :  { %4343 = vrcp.f32 %v851_v14  ;;  %v854_v16 = vpop.xlane.xlu1 %853 }
 0x36b   :  { %4345 = vrcp.f32 %v854_v16 }
 0x36e   :  { %v860_v18 = vpop.xlane.xlu1 %859 }
 0x36f   :  { %4347 = vrcp.f32 %v860_v18  ;;  %v857_v19 = vpop.xlane.xlu0 %856 }
 0x370   :  { %v4342_v20 = vpop.eup %4341  ;;  %4349 = vrcp.f32 %v857_v19 }
 0x371   :  { %v878_v21 = vmul.f32 %v4342_v20, %v4326_v35 }
 0x373   :  { %v863_v22 = vpop.xlane.xlu0 %862  ;;  %4019 = vmatmul.mubr.msk.f32.vlgmr.msra.gmra.mrb[6].mxu0 %vm168_vm2, %v878_v21  ;;  %v4771_v21 = vld [vmem:[%s5151_s5] sm:$0x3] }
 0x374   :  { %v4344_v15 = vpop.eup %4343  ;;  %4351 = vrcp.f32 %v863_v22  ;;  %4027 = vmatpush3.msra.mxu0 %v1046_v3  ;;  %4028 = vmatprep.mubr.msk.f32.mxu0 %vm4414_vm1, %v4413_v10  ;;  %v1538_v22 = vrot.slane %v4771_v21, %v4545_v11 }
 0x375   :  { %v4346_v23 = vpop.eup %4345  ;;  %v879_v24 = vmul.f32 %v4344_v15, %v4328_v44  ;;  %4036 = vmatprep.subr.mxu0 %v4413_v10 }
 0x376   :  { %v880_v25 = vmul.f32 %v4346_v23, %v4330_v45  ;;  %v866_v26 = vpop.xlane.xlu1 %865 }
 0x377   :  { %4353 = vrcp.f32 %v866_v26  ;;  %v869_v27 = vpop.xlane.xlu0 %868  ;;  %4024 = vmatmul.mubr.msk.f32.vlgmr.msra.gmra.mrb[12].mxu1 %vm168_vm2, %v879_v24 }
 0x378   :  { %4355 = vrcp.f32 %v869_v27  ;;  %4032 = vmatpush3.msra.mxu1 %v1128_v4  ;;  %4029 = vmatmul.mubr.msk.f32.vlgmr.msra.gmra.mrb[8].mxu0 %vm168_vm2, %v880_v25 }
 0x379   :  { %v4348_v28 = vpop.eup %4347  ;;  %4037 = vmatpush3.msra.mxu0 %v1210_v8  ;;  %4033 = vmatprep.mubr.msk.f32.mxu1 %vm4414_vm1, %v4413_v10 }
 0x37a   :  { %v4350_v17 = vpop.eup %4349  ;;  %v882_v29 = vmul.f32 %v4348_v28, %v4332_v54  ;;  %4038 = vmatprep.mubr.msk.f32.mxu0 %vm4414_vm1, %v4413_v10  ;;  %4041 = vmatprep.subr.mxu1 %v4413_v10  ;;  %v1449_v36 = vpop.permute.xlu1 %1448  ;;  %v1534_v54 = vld [vmem:[%s5150_s4 + $0x18] sm:$0xff] }
 0x37b   :  { %v881_v30 = vmul.f32 %v4350_v17, %v4334_v55  ;;  %v1368_v31 = vpop.permute.xlu0 %1367  ;;  %4046 = vmatprep.subr.mxu0 %v4413_v10  ;;  %v4241_v55 = vpack.c.bf16 %v1534_v54, %v1533_v53  ;;  %v4796_v54 = vld [vmem:[%s5153_s6] sm:$0x3] }
 0x37c   :  { %4039 = vmatmul.mubr.msk.f32.vlgmr.msra.gmra.mrb[10].mxu0 %vm168_vm2, %v882_v29 }
 0x37d   :  { %4034 = vmatmul.mubr.msk.f32.vlgmr.msra.gmra.mrb[14].mxu1 %vm168_vm2, %v881_v30  ;;  %4047 = vmatpush3.msra.mxu0 %v1368_v31 }
 0x37e   :  { %v4352_v32 = vpop.eup %4351  ;;  %4042 = vmatpush3.msra.mxu1 %v1287_v6  ;;  %4043 = vmatprep.mubr.msk.f32.mxu1 %vm4414_vm1, %v4413_v10 }
 0x37f   :  { %v883_v33 = vmul.f32 %v4352_v32, %v4336_v59  ;;  %4051 = vmatprep.subr.mxu1 %v4413_v10  ;;  %4048 = vmatprep.mubr.msk.f32.mxu0 %vm4414_vm1, %v4413_v10 }
 0x380   :  { %4238 = vmatprep.subr.bf16.mxu0 %v4237_v52 }
 0x381   :  { %v4354_v35 = vpop.eup %4353  ;;  %4044 = vmatmul.mubr.msk.f32.vlgmr.msra.gmra.mrb[16].mxu1 %vm168_vm2, %v883_v33 }
 0x382   :  { %v4356_v37 = vpop.eup %4355  ;;  %v884_v39 = vmul.f32 %v4354_v35, %v4702_v61  ;;  %4052 = vmatpush3.msra.mxu1 %v1449_v36  ;;  %4053 = vmatprep.mubr.msk.f32.mxu1 %vm4414_vm1, %v4413_v10 }
 0x383   :  { %v885_v41 = vmul.f32 %v4356_v37, %v4704_v62 }
 0x384   :  { %4049 = vmatmul.mubr.msk.f32.vlgmr.msra.gmra.mrb[12].mxu0 %vm168_vm2, %v884_v39 }
 0x385   :  { %4054 = vmatmul.mubr.msk.f32.vlgmr.msra.gmra.mrb[18].mxu1 %vm168_vm2, %v885_v41  ;;  %4240 = vmatpush3.bf16.msra.mxu0 %v4237_v52  ;;  %v1662_v41 = vld [vmem:[%s5152_s8 + $0x8] sm:$0xff] }
 0x386   :  { %4242 = vmatprep.subr.bf16.mxu0 %v4241_v55 }
 0x389   :  { %4244 = vmatpush3.bf16.msra.mxu0 %v4241_v55  ;;  %v4801_v55 = vld [vmem:[%s5154_s7] sm:$0x3] }
 0x446   :  { %v958_v42 = vpop.f32.mrb[6].mxu0 }
 0x447   :  { %962 = vst.msk [vmem:[#allocation2] sm:$0xff] %vm168_vm2, %v958_v42  ;;  %v4020_v43 = vpop.f32.mrb[7].mxu0 }
 0x448   :  { %v1663_v43 = vld [vmem:[%s5152_s8 + $0x10] sm:$0xff] }
 0x44a   :  { %v1035_v44 = vpop.f32.mrb[12].mxu1 }
 0x44b   :  { %v1117_v45 = vpop.f32.mrb[8].mxu0  ;;  %1040 = vrot.lane.b32.xlu0 %v1035_v44, %s4426_s28  ;;  %v4025_v46 = vpop.f32.mrb[13].mxu1  ;;  %v1664_v44 = vld [vmem:[%s5152_s8 + $0x18] sm:$0xff] }
 0x44c   :  { %1122 = vrot.lane.b32.xlu1 %v1117_v45, %s4427_s18  ;;  %v4030_v51 = vpop.f32.mrb[9].mxu0  ;;  %v4249_v45 = vpack.c.bf16 %v1664_v44, %v1663_v43 }
 0x44f   :  { %v1281_v56 = vpop.f32.mrb[10].mxu0 }
 0x450   :  { %v1199_v58 = vpop.f32.mrb[14].mxu1  ;;  %1285 = vst.msk [vmem:[#allocation2 + $0x8] sm:$0xff] %vm168_vm2, %v1281_v56  ;;  %v4040_v59 = vpop.f32.mrb[11].mxu0  ;;  %v1652_v56 = vrot.slane %v4796_v54, %v4545_v11 }
 0x451   :  { %1204 = vrot.lane.b32.xlu1 %v1199_v58, %s4428_s29  ;;  %v4035_v60 = vpop.f32.mrb[15].mxu1 }
 0x452   :  { %v1658_v60 = vrot.slane %v4801_v55, %v4545_v11 }
 0x454   :  { %v1358_v61 = vpop.f32.mrb[16].mxu1 }
 0x455   :  { %1363 = vrot.lane.b32.xlu0 %v1358_v61, %s4426_s28  ;;  %v4045_v62 = vpop.f32.mrb[17].mxu1 }
 0x457   :  { %v1439_v1 = vpop.f32.mrb[12].mxu0 }
 0x458   :  { %v1520_v2 = vpop.f32.mrb[18].mxu1  ;;  %v4050_v3 = vpop.f32.mrb[13].mxu0 }
 0x459   :  { %1444 = vrot.lane.b32.xlu0 %v1439_v1, %s4427_s18  ;;  %1525 = vrot.lane.b32.xlu1 %v1520_v2, %s4428_s29  ;;  %v4055_v4 = vpop.f32.mrb[19].mxu1 }
 0x4bd   :  { %v1041_v6 = vpop.permute.xlu0 %1040 }
 0x4be   :  { %1044 = vst.msk [vmem:[#allocation2] sm:$0xff] %vm1043_vm3, %v1041_v6  ;;  %v1123_v8 = vpop.permute.xlu1 %1122  ;;  %v1768_v6 = vld [vmem:[%s5155_s10] sm:$0xff] }
 0x4bf   :  { %1126 = vst.msk [vmem:[#allocation2] sm:$0xff] %vm1125_vm4, %v1123_v8  ;;  %v1769_v8 = vld [vmem:[%s5155_s10 + $0x8] sm:$0xff] }
 0x4c3   :  { %v1205_v13 = vpop.permute.xlu1 %1204 }
 0x4c4   :  { %1208 = vst.msk [vmem:[#allocation2] sm:$0xff] %vm1207_vm5, %v1205_v13  ;;  %v4253_v13 = vpack.c.bf16 %v1769_v8, %v1768_v6 }
 0x4c6   :  { %4254 = vmatprep.subr.bf16.mxu0 %v4253_v13 }
 0x4c7   :  { %v1364_v14 = vpop.permute.xlu0 %1363 }
 0x4c8   :  { %1366 = vst.msk [vmem:[#allocation2 + $0x8] sm:$0xff] %vm1043_vm3, %v1364_v14  ;;  %v1770_v14 = vld [vmem:[%s5155_s10 + $0x10] sm:$0xff] }
 0x4cb   :  { %v1445_v16 = vpop.permute.xlu0 %1444  ;;  %v1526_v18 = vpop.permute.xlu1 %1525  ;;  %v1529_v19 = vld [vmem:[#allocation2] sm:$0xff] }
 0x4cc   :  { %1447 = vst.msk [vmem:[#allocation2 + $0x8] sm:$0xff] %vm1125_vm4, %v1445_v16  ;;  %4064 = vmatprep.mubr.msk.f32.mxu0 %vm81_vm0, %v1529_v19  ;;  %v1771_v16 = vld [vmem:[%s5155_s10 + $0x18] sm:$0xff]  ;;  %v1772_v19 = vld [vmem:[%s5155_s10 + $0x20] sm:$0xff] }
 0x4cd   :  { %1528 = vst.msk [vmem:[#allocation2 + $0x8] sm:$0xff] %vm1207_vm5, %v1526_v18  ;;  %v4257_v18 = vpack.c.bf16 %v1771_v16, %v1770_v14 }
 0x4d4   :  { %v1530_v20 = vld [vmem:[#allocation2 + $0x8] sm:$0xff] }
 0x4d5   :  { %4065 = vmatmul.mubr.msk.f32.vlgmr.msra.gmra.mrb[14].mxu0 %vm81_vm0, %v1530_v20  ;;  %v1773_v20 = vld [vmem:[%s5155_s10 + $0x28] sm:$0xff] }
 0x4d6   :  { %4256 = vmatpush3.bf16.msra.mxu0 %v4253_v13 }
 0x4d7   :  { %4258 = vmatprep.subr.bf16.mxu0 %v4257_v18 }
 0x4da   :  { %4260 = vmatpush3.bf16.msra.mxu0 %v4257_v18 }
 0x5a8   :  { %v4066_v15 = vpop.f32.mrb[14].mxu0 }
 0x5a9   :  { %v1617_v23 = vadd.f32 %v4066_v15, %v1538_v22  ;;  %v1611_v24 = vpop.f32.mrb[15].mxu0  ;;  %v1774_v15 = vld [vmem:[%s5155_s10 + $0x30] sm:$0xff] }
 0x5aa   :  { %v1612_v25 = vadd.f32 %v1611_v24, %v1538_v22  ;;  %v4261_v22 = vpack.c.bf16 %v1773_v20, %v1772_v19 }
 0x5ab   :  { %v1621_v26 = vadd.f32 %v1617_v23, %v4536_v7  ;;  %v1775_v23 = vld [vmem:[%s5155_s10 + $0x38] sm:$0xff] }
 0x5ac   :  { %v1620_v27 = vadd.f32 %v1612_v25, %v4529_v5  ;;  %v1661_v5 = vld [vmem:[%s5152_s8] sm:$0xff]  ;;  %4262 = vmatprep.subr.bf16.mxu0 %v4261_v22  ;;  %v4265_v24 = vpack.c.bf16 %v1775_v23, %v1774_v15  ;;  %v3793_v23 = vld [vmem:[%s5173_s23 + $0x30] sm:$0xff] }
 0x5ad   :  { %v1625_v28 = vsel %vm81_vm0, %v1621_v26, 0.0  ;;  %v4245_v42 = vpack.c.bf16 %v1662_v41, %v1661_v5  ;;  %4264 = vmatpush3.bf16.msra.mxu0 %v4261_v22  ;;  %v4840_v25 = vld [vmem:[%s5156_s9] sm:$0x3]  ;;  %v3792_v22 = vld [vmem:[%s5173_s23 + $0x28] sm:$0xff] }
 0x5ae   :  { %1626 = vadd.xlane.f32.xlu1 %v1625_v28  ;;  %v1622_v17 = vsel %vm81_vm0, %v1620_v27, 0.0  ;;  %4266 = vmatprep.subr.bf16.mxu0 %v4265_v24 }
 0x5af   :  { %1623 = vadd.xlane.f32.xlu0 %v1622_v17  ;;  %4246 = vmatprep.subr.bf16.mxu1 %v4245_v42 }
 0x5b0   :  { %4248 = vmatpush3.bf16.msra.mxu1 %v4245_v42 }
 0x5b1   :  { %4250 = vmatprep.subr.bf16.mxu1 %v4249_v45  ;;  %4268 = vmatpush3.bf16.msra.mxu0 %v4265_v24  ;;  %v3794_v24 = vld [vmem:[%s5173_s23 + $0x38] sm:$0xff] }
 0x5b2   :  { %4118 = vmatprep.subr.mxu0 %v4413_v10 }
 0x5b4   :  { %4252 = vmatpush3.bf16.msra.mxu1 %v4249_v45 }
 0x63b   :  { %v1627_v29 = vpop.xlane.xlu1 %1626 }
 0x63c   :  { %v1630_v30 = vmul.f32 0.03125, %v1627_v29  ;;  %v1624_v31 = vpop.xlane.xlu0 %1623 }
 0x63d   :  { %v1629_v32 = vmul.f32 0.03125, %v1624_v31 }
 0x63e   :  { %v1632_v33 = vsub.f32 %v1621_v26, %v1630_v30  ;;  %v1668_v26 = vrot.slane %v4840_v25, %v4545_v11 }
 0x63f   :  { %v1631_v35 = vsub.f32 %v1620_v27, %v1629_v32 }
 0x640   :  { %v1634_v39 = vmul.f32 %v1632_v33, %v1632_v33 }
 0x641   :  { %v1633_v36 = vmul.f32 %v1631_v35, %v1631_v35 }
 0x642   :  { %v1638_v7 = vsel %vm81_vm0, %v1634_v39, 0.0 }
 0x643   :  { %v1635_v37 = vsel %vm81_vm0, %v1633_v36, 0.0 }
 0x644   :  { %1636 = vadd.xlane.f32.xlu0 %v1635_v37 }
 0x648   :  { %1639 = vadd.xlane.f32.xlu0 %v1638_v7 }
 0x6d1   :  { %v1637_v46 = vpop.xlane.xlu0 %1636 }
 0x6d2   :  { %v1641_v47 = vmul.f32 0.03125, %v1637_v46 }
 0x6d4   :  { %v1643_v50 = vadd.f32 1e-12, %v1641_v47 }
 0x6d5   :  { %v1640_v51 = vpop.xlane.xlu0 %1639 }
 0x6d6   :  { %4357 = vrsqrt.f32 %v1643_v50  ;;  %v1642_v52 = vmul.f32 0.03125, %v1640_v51  ;;  %v4851_v51 = vld [vmem:[%s5157_s11] sm:$0x3] }
 0x6d8   :  { %v1644_v53 = vadd.f32 1e-12, %v1642_v52  ;;  %v1779_v52 = vrot.slane %v4851_v51, %v4545_v11 }
 0x6da   :  { %4359 = vrsqrt.f32 %v1644_v53 }
 0x6e0   :  { %v4358_v58 = vpop.eup %4357 }
 0x6e1   :  { %v1647_v59 = vmul.f32 %v4358_v58, %v1631_v35 }
 0x6e3   :  { %v1653_v61 = vmul.f32 %v1652_v56, %v1647_v59 }
 0x6e4   :  { %v4360_v62 = vpop.eup %4359 }
 0x6e5   :  { %v1648_v1 = vmul.f32 %v4360_v62, %v1632_v33  ;;  %v4807_v2 = vadd.f32 %v1658_v60, %v1653_v61 }
 0x6e7   :  { %v1654_v3 = vmul.f32 %v1652_v56, %v1648_v1  ;;  %4075 = vmatprep.mubr.msk.f32.mxu1 %vm81_vm0, %v4807_v2 }
 0x6e9   :  { %v1660_v4 = vadd.f32 %v1658_v60, %v1654_v3 }
 0x6eb   :  { %4076 = vmatmul.mubr.msk.f32.vlgmr.msra.gmra.mrb[20].mxu1 %vm81_vm0, %v1660_v4 }
 0x7be   :  { %v4077_v27 = vpop.f32.mrb[20].mxu1 }
 0x7bf   :  { %v1747_v28 = vadd.f32 %v4077_v27, %v1668_v26  ;;  %v1741_v17 = vpop.f32.mrb[21].mxu1 }
 0x7c0   :  { %v1742_v29 = vadd.f32 %v1741_v17, %v1668_v26  ;;  %v4273_v26 = vpack.c.bf16 %v3794_v24, %v3793_v23 }
 0x7c1   :  { %v1753_v30 = vmul.f32 0.044715, %v1747_v28  ;;  %v1751_v46 = vmul.f32 0.5, %v1747_v28 }
 0x7c2   :  { %v1752_v31 = vmul.f32 0.044715, %v1742_v29  ;;  %v1750_v44 = vmul.f32 0.5, %v1742_v29 }
 0x7c3   :  { %v1755_v32 = vmul.f32 %v1753_v30, %v1747_v28 }
 0x7c4   :  { %v1754_v33 = vmul.f32 %v1752_v31, %v1742_v29 }
 0x7c5   :  { %v1757_v35 = vmul.f32 %v1755_v32, %v1747_v28  ;;  %v4876_v32 = vld [vmem:[%s5158_s12] sm:$0x3]  ;;  %s5174_s12 = smov 64  }
 0x7c6   :  { %v1756_v36 = vmul.f32 %v1754_v33, %v1742_v29  ;;  %v4881_v33 = vld [vmem:[%s5159_s13] sm:$0x3]  ;;  %s5175_s13 = smov 48  }
 0x7c7   :  { %v1759_v37 = vadd.f32 %v1757_v35, %v1747_v28  ;;  %v1893_v35 = vrot.slane %v4876_v32, %v4545_v11 }
 0x7c8   :  { %v1758_v39 = vadd.f32 %v1756_v36, %v1742_v29 }
 0x7c9   :  { %v1761_v7 = vmul.f32 0.7978846, %v1759_v37 }
 0x7ca   :  { %v1760_v5 = vmul.f32 0.7978846, %v1758_v39 }
 0x7cb   :  { %4361 = vtanh.f32 %v1761_v7 }
 0x7cc   :  { %4363 = vtanh.f32 %v1760_v5  ;;  %v1899_v5 = vrot.slane %v4881_v33, %v4545_v11 }
 0x7d5   :  { %v4362_v41 = vpop.eup %4361 }
 0x7d6   :  { %v4364_v42 = vpop.eup %4363  ;;  %v1765_v43 = vadd.f32 1.0, %v4362_v41 }
 0x7d7   :  { %v1764_v45 = vadd.f32 1.0, %v4364_v42 }
 0x7d8   :  { %v1767_v50 = vmul.f32 %v1765_v43, %v1751_v46 }
 0x7d9   :  { %v1766_v47 = vmul.f32 %v1764_v45, %v1750_v44  ;;  %v4898_v45 = vsub.s32 1, %v4540_v9 }
 0x7db   :  { %4094 = vmatprep.mubr.msk.f32.mxu0 %vm1780_vm6, %v1766_v47  ;;  %v1910_v11 = vrot.slane %v4550_v12, %v4898_v45 }
 0x7dc   :  { %4095 = vmatmul.mubr.msk.f32.vlgmr.msra.gmra.mrb[16].mxu0 %vm1780_vm6, %v1767_v50 }
 0x7dd   :  { %4120 = vmatprep.mubr.msk.f32.mxu0 %vm4414_vm1, %v4413_v10 }
 0x8af   :  { %v4096_v53 = vpop.f32.mrb[16].mxu0 }
 0x8b0   :  { %v1859_v56 = vadd.f32 %v4096_v53, %v1779_v52  ;;  %v1853_v58 = vpop.f32.mrb[17].mxu0 }
 0x8b1   :  { %v1854_v59 = vadd.f32 %v1853_v58, %v1779_v52 }
 0x8b2   :  { %v1863_v60 = vadd.f32 %v1859_v56, %v1660_v4 }
 0x8b3   :  { %v1862_v61 = vadd.f32 %v1854_v59, %v4807_v2  ;;  %v3791_v2 = vld [vmem:[%s5173_s23 + $0x20] sm:$0xff] }
 0x8b4   :  { %v1867_v62 = vsel %vm81_vm0, %v1863_v60, 0.0  ;;  %v4269_v15 = vpack.c.bf16 %v3792_v22, %v3791_v2 }
 0x8b5   :  { %1868 = vadd.xlane.f32.xlu0 %v1867_v62  ;;  %v1864_v1 = vsel %vm81_vm0, %v1862_v61, 0.0 }
 0x8b6   :  { %1865 = vadd.xlane.f32.xlu1 %v1864_v1  ;;  %4270 = vmatprep.subr.bf16.mxu1 %v4269_v15 }
 0x8b7   :  { %4272 = vmatpush3.bf16.msra.mxu1 %v4269_v15 }
 0x8b8   :  { %4274 = vmatprep.subr.bf16.mxu1 %v4273_v26 }
 0x8bb   :  { %4276 = vmatpush3.bf16.msra.mxu1 %v4273_v26 }
 0x8bc   :  { %4108 = vmatprep.subr.mxu1 %v4413_v10 }
 0x942   :  { %v1869_v3 = vpop.xlane.xlu0 %1868 }
 0x943   :  { %v1871_v6 = vmul.f32 0.03125, %v1869_v3  ;;  %v1866_v8 = vpop.xlane.xlu1 %1865 }
 0x944   :  { %v1870_v13 = vmul.f32 0.03125, %v1866_v8 }
 0x945   :  { %v1873_v14 = vsub.f32 %v1863_v60, %v1871_v6 }
 0x946   :  { %v1872_v16 = vsub.f32 %v1862_v61, %v1870_v13 }
 0x947   :  { %v1875_v18 = vmul.f32 %v1873_v14, %v1873_v14 }
 0x948   :  { %v1874_v19 = vmul.f32 %v1872_v16, %v1872_v16 }
 0x949   :  { %v1879_v20 = vsel %vm81_vm0, %v1875_v18, 0.0 }
 0x94a   :  { %1880 = vadd.xlane.f32.xlu0 %v1879_v20  ;;  %v1876_v4 = vsel %vm81_vm0, %v1874_v19, 0.0 }
 0x94b   :  { %1877 = vadd.xlane.f32.xlu1 %v1876_v4 }
 0x9d7   :  { %v1881_v27 = vpop.xlane.xlu0 %1880 }
 0x9d8   :  { %v1883_v28 = vmul.f32 0.03125, %v1881_v27  ;;  %v1878_v17 = vpop.xlane.xlu1 %1877 }
 0x9d9   :  { %v1882_v29 = vmul.f32 0.03125, %v1878_v17 }
 0x9da   :  { %v1885_v30 = vadd.f32 1e-12, %v1883_v28 }
 0x9db   :  { %v1884_v31 = vadd.f32 1e-12, %v1882_v29 }
 0x9dc   :  { %4365 = vrsqrt.f32 %v1885_v30 }
 0x9dd   :  { %4367 = vrsqrt.f32 %v1884_v31 }
 0x9e6   :  { %v4366_v36 = vpop.eup %4365 }
 0x9e7   :  { %v4368_v37 = vpop.eup %4367  ;;  %v1889_v39 = vmul.f32 %v4366_v36, %v1873_v14 }
 0x9e8   :  { %v1888_v7 = vmul.f32 %v4368_v37, %v1872_v16 }
 0x9e9   :  { %v1895_v41 = vmul.f32 %v1893_v35, %v1889_v39 }
 0x9ea   :  { %v1894_v42 = vmul.f32 %v1893_v35, %v1888_v7 }
 0x9eb   :  { %v4889_v44 = vadd.f32 %v1899_v5, %v1895_v41 }
 0x9ec   :  { %v4887_v43 = vadd.f32 %v1899_v5, %v1894_v42 }
 0x9ee   :  { %4105 = vmatprep.mubr.msk.f32.mxu1 %vm81_vm0, %v4887_v43 }
 0x9ef   :  { %4106 = vmatmul.mubr.msk.f32.vlgmr.msra.gmra.mrb[22].mxu1 %vm81_vm0, %v4889_v44 }
 0x9f0   :  { %4110 = vmatprep.mubr.msk.f32.mxu1 %vm4414_vm1, %v4413_v10 }
 0xac2   :  { %v4107_v46 = vpop.f32.mrb[22].mxu1 }
 0xac3   :  { %v4902_v47 = vadd.f32 %v4107_v46, %v1910_v11  ;;  %v1983_v50 = vpop.f32.mrb[23].mxu1 }
 0xac4   :  { %v4908_v52 = vadd.f32 %v1983_v50, %v1910_v11 }
 0xac5   :  { %2386 = vrot.lane.b32.xlu0 %v4902_v47, %s4415_s0  ;;  %2307 = vrot.lane.b32.xlu1 %v4902_v47, %s4416_s3  ;;  %v1993_v12 = vmul.f32 0.35355338, %v4902_v47 }
 0xac6   :  { %v1992_v9 = vmul.f32 0.35355338, %v4908_v52 }
 0xac9   :  { %2074 = vrot.lane.b32.xlu0 %v4908_v52, %s4415_s0  ;;  %1995 = vrot.lane.b32.xlu1 %v4908_v52, %s4416_s3  ;;  %s5176_s0 = smov 40   ;;  %s5177_s3 = smov 56  }
 0xacd   :  { %2230 = vrot.lane.b32.xlu0 %v4908_v52, %s4419_s24  ;;  %2152 = vrot.lane.b32.xlu1 %v4908_v52, %s4417_s21 }
 0xad1   :  { %2228 = vrot.lane.b32.xlu0 %v1992_v9, %s4421_s26  ;;  %2072 = vrot.lane.b32.xlu1 %v1992_v9, %s4418_s22 }
 0xad5   :  { %2464 = vrot.lane.b32.xlu0 %v4902_v47, %s4417_s21  ;;  %2150 = vrot.lane.b32.xlu1 %v1992_v9, %s4420_s25 }
 0xad9   :  { %2462 = vrot.lane.b32.xlu0 %v1993_v12, %s4420_s25  ;;  %2384 = vrot.lane.b32.xlu1 %v1993_v12, %s4418_s22 }
 0xadd   :  { %2542 = vrot.lane.b32.xlu1 %v4902_v47, %s4419_s24 }
 0xae1   :  { %2540 = vrot.lane.b32.xlu1 %v1993_v12, %s4421_s26 }
 0xb37   :  { %v2387_v53 = vpop.permute.xlu0 %2386  ;;  %v2308_v56 = vpop.permute.xlu1 %2307 }
 0xb3b   :  { %v2075_v58 = vpop.permute.xlu0 %2074  ;;  %v1996_v59 = vpop.permute.xlu1 %1995 }
 0xb3c   :  { %4109 = vmatpush3.xpose.msk.msra.mxu1 %vm168_vm2, %v1996_v59 }
 0xb3d   :  { %4113 = vmatprep.subr.mxu1 %v4413_v10 }
 0xb3f   :  { %v2231_v60 = vpop.permute.xlu0 %2230  ;;  %v2153_v61 = vpop.permute.xlu1 %2152  ;;  %4111 = vmatmul.mubr.msk.f32.vlgmr.msra.gmra.mrb[24].mxu1 %vm168_vm2, %v1992_v9 }
 0xb40   :  { %4114 = vmatpush3.xpose.msk.msra.mxu1 %vm168_vm2, %v2075_v58  ;;  %4119 = vmatpush3.xpose.msk.msra.mxu0 %vm168_vm2, %v2153_v61 }
 0xb41   :  { %4115 = vmatprep.mubr.msk.f32.mxu1 %vm4414_vm1, %v4413_v10  ;;  %4123 = vmatprep.subr.mxu1 %v4413_v10 }
 0xb42   :  { %4128 = vmatprep.subr.mxu0 %v4413_v10 }
 0xb43   :  { %v2229_v62 = vpop.permute.xlu0 %2228  ;;  %v2073_v1 = vpop.permute.xlu1 %2072 }
 0xb44   :  { %4116 = vmatmul.mubr.msk.f32.vlgmr.msra.gmra.mrb[26].mxu1 %vm168_vm2, %v2073_v1 }
 0xb45   :  { %4124 = vmatpush3.xpose.msk.msra.mxu1 %vm168_vm2, %v2231_v60  ;;  %4125 = vmatprep.mubr.msk.f32.mxu1 %vm4414_vm1, %v4413_v10 }
 0xb46   :  { %4133 = vmatprep.subr.mxu1 %v4413_v10 }
 0xb47   :  { %v2151_v3 = vpop.permute.xlu1 %2150  ;;  %v2465_v6 = vpop.permute.xlu0 %2464 }
 0xb48   :  { %4121 = vmatmul.mubr.msk.f32.vlgmr.msra.gmra.mrb[18].mxu0 %vm168_vm2, %v2151_v3  ;;  %4126 = vmatmul.mubr.msk.f32.vlgmr.msra.gmra.mrb[28].mxu1 %vm168_vm2, %v2229_v62 }
 0xb49   :  { %4129 = vmatpush3.xpose.msk.msra.mxu0 %vm168_vm2, %v2308_v56  ;;  %4134 = vmatpush3.xpose.msk.msra.mxu1 %vm168_vm2, %v2387_v53 }
 0xb4a   :  { %4130 = vmatprep.mubr.msk.f32.mxu0 %vm4414_vm1, %v4413_v10  ;;  %4138 = vmatprep.subr.mxu0 %v4413_v10 }
 0xb4b   :  { %v2385_v8 = vpop.permute.xlu1 %2384  ;;  %4135 = vmatprep.mubr.msk.f32.mxu1 %vm4414_vm1, %v4413_v10  ;;  %4143 = vmatprep.subr.mxu1 %v4413_v10  ;;  %v2463_v13 = vpop.permute.xlu0 %2462 }
 0xb4c   :  { %4131 = vmatmul.mubr.msk.f32.vlgmr.msra.gmra.mrb[20].mxu0 %vm168_vm2, %v1993_v12  ;;  %4136 = vmatmul.mubr.msk.f32.vlgmr.msra.gmra.mrb[30].mxu1 %vm168_vm2, %v2385_v8 }
 0xb4d   :  { %4139 = vmatpush3.xpose.msk.msra.mxu0 %vm168_vm2, %v2465_v6  ;;  %4140 = vmatprep.mubr.msk.f32.mxu0 %vm4414_vm1, %v4413_v10 }
 0xb4e   :  { %4145 = vmatprep.mubr.msk.f32.mxu1 %vm4414_vm1, %v4413_v10  ;;  %4148 = vmatprep.subr.mxu0 %v4413_v10 }
 0xb4f   :  { %v2543_v14 = vpop.permute.xlu1 %2542 }
 0xb50   :  { %4141 = vmatmul.mubr.msk.f32.vlgmr.msra.gmra.mrb[22].mxu0 %vm168_vm2, %v2463_v13  ;;  %4144 = vmatpush3.xpose.msk.msra.mxu1 %vm168_vm2, %v2543_v14 }
 0xb51   :  { %4153 = vmatprep.subr.mxu1 %v4413_v10  ;;  %4150 = vmatprep.mubr.msk.f32.mxu0 %vm4414_vm1, %v4413_v10 }
 0xb53   :  { %v2541_v16 = vpop.permute.xlu1 %2540 }
 0xb54   :  { %4146 = vmatmul.mubr.msk.f32.vlgmr.msra.gmra.mrb[32].mxu1 %vm168_vm2, %v2541_v16 }
 0xb55   :  { %4155 = vmatprep.mubr.msk.f32.mxu1 %vm4414_vm1, %v4413_v10 }
 0xc12   :  { %v2068_v18 = vpop.f32.mrb[24].mxu1 }
 0xc13   :  { %v2618_v19 = vadd.f32 %v2068_v18, %v4629_v34  ;;  %v4112_v20 = vpop.f32.mrb[25].mxu1 }
 0xc15   :  { %v2626_v4 = vsel %vm168_vm2, %v2618_v19, -inf }
 0xc16   :  { %2627 = vmax.xlane.f32.xlu0 %v2626_v4 }
 0xc17   :  { %v2146_v2 = vpop.f32.mrb[26].mxu1 }
 0xc18   :  { %v2619_v22 = vadd.f32 %v2146_v2, %v4635_v38  ;;  %v4117_v15 = vpop.f32.mrb[27].mxu1 }
 0xc1a   :  { %v2629_v23 = vsel %vm168_vm2, %v2619_v22, -inf }
 0xc1b   :  { %v2224_v24 = vpop.f32.mrb[18].mxu0  ;;  %2630 = vmax.xlane.f32.xlu1 %v2629_v23  ;;  %v2302_v26 = vpop.f32.mrb[28].mxu1 }
 0xc1c   :  { %v2620_v27 = vadd.f32 %v2224_v24, %v4641_v40  ;;  %v4122_v28 = vpop.f32.mrb[19].mxu0  ;;  %v4127_v17 = vpop.f32.mrb[29].mxu1  ;;  %v2621_v29 = vadd.f32 %v2302_v26, %v4654_v49 }
 0xc1e   :  { %v2632_v34 = vsel %vm168_vm2, %v2620_v27, -inf  ;;  %v2635_v7 = vsel %vm168_vm2, %v2621_v29, -inf }
 0xc1f   :  { %v2380_v30 = vpop.f32.mrb[20].mxu0  ;;  %2633 = vmax.xlane.f32.xlu0 %v2632_v34  ;;  %v2458_v31 = vpop.f32.mrb[30].mxu1 }
 0xc20   :  { %v2622_v35 = vadd.f32 %v2380_v30, %v4649_v48  ;;  %v4132_v38 = vpop.f32.mrb[21].mxu0  ;;  %v4137_v36 = vpop.f32.mrb[31].mxu1  ;;  %v2623_v37 = vadd.f32 %v2458_v31, %v4662_v57 }
 0xc22   :  { %v2638_v39 = vsel %vm168_vm2, %v2622_v35, -inf  ;;  %v2641_v42 = vsel %vm168_vm2, %v2623_v37, -inf }
 0xc23   :  { %v2536_v40 = vpop.f32.mrb[22].mxu0  ;;  %2639 = vmax.xlane.f32.xlu1 %v2638_v39  ;;  %2636 = vmax.xlane.f32.xlu0 %v2635_v7 }
 0xc24   :  { %v2624_v49 = vadd.f32 %v2536_v40, %v4670_v63  ;;  %v4142_v5 = vpop.f32.mrb[23].mxu0 }
 0xc26   :  { %v2644_v41 = vsel %vm168_vm2, %v2624_v49, -inf }
 0xc27   :  { %2645 = vmax.xlane.f32.xlu1 %v2644_v41  ;;  %2642 = vmax.xlane.f32.xlu0 %v2641_v42  ;;  %v2614_v48 = vpop.f32.mrb[32].mxu1 }
 0xc28   :  { %v2625_v11 = vadd.f32 %v2614_v48, %v4675_v0  ;;  %v4147_v57 = vpop.f32.mrb[33].mxu1 }
 0xc2a   :  { %v2647_v46 = vsel %vm168_vm2, %v2625_v11, -inf }
 0xc2b   :  { %2648 = vmax.xlane.f32.xlu0 %v2647_v46 }
 0xc38   :  { %2714 = vrot.lane.b32.xlu1 %v4908_v52, %s5174_s12 }
 0xc3c   :  { %2872 = vrot.lane.b32.xlu1 %v4908_v52, %s5175_s13 }
 0xc40   :  { %2953 = vrot.lane.b32.xlu1 %v4908_v52, %s5176_s0 }
 0xc41   :  { %2791 = vrot.lane.b32.xlu0 %v4908_v52, %s5177_s3 }
 0xc44   :  { %3111 = vrot.lane.b32.xlu1 %v4902_v47, %s5177_s3 }
 0xc45   :  { %3034 = vrot.lane.b32.xlu0 %v4902_v47, %s5174_s12 }
 0xca3   :  { %v2628_v63 = vpop.xlane.xlu0 %2627 }
 0xca4   :  { %v2650_v0 = vsub.f32 %v2618_v19, %v2628_v63 }
 0xca6   :  { %v2658_v50 = vmul.f32 1.442695, %v2650_v0 }
 0xca8   :  { %4369 = vpow2.f32 %v2658_v50  ;;  %v2631_v9 = vpop.xlane.xlu1 %2630 }
 0xca9   :  { %v2651_v12 = vsub.f32 %v2619_v22, %v2631_v9 }
 0xcab   :  { %v2660_v53 = vmul.f32 1.442695, %v2651_v12 }
 0xcac   :  { %v2634_v56 = vpop.xlane.xlu0 %2633 }
 0xcad   :  { %4371 = vpow2.f32 %v2660_v53  ;;  %v2652_v58 = vsub.f32 %v2620_v27, %v2634_v56 }
 0xcaf   :  { %v2662_v59 = vmul.f32 1.442695, %v2652_v58 }
 0xcb0   :  { %v2640_v60 = vpop.xlane.xlu1 %2639  ;;  %v2637_v61 = vpop.xlane.xlu0 %2636 }
 0xcb1   :  { %4373 = vpow2.f32 %v2662_v59  ;;  %v2654_v52 = vsub.f32 %v2622_v35, %v2640_v60  ;;  %v2653_v62 = vsub.f32 %v2621_v29, %v2637_v61 }
 0xcb2   :  { %v4370_v1 = vpop.eup %4369 }
 0xcb3   :  { %v2666_v3 = vmul.f32 1.442695, %v2654_v52  ;;  %v2664_v6 = vmul.f32 1.442695, %v2653_v62  ;;  %v2674_v8 = vsel %vm168_vm2, %v4370_v1, 0.0 }
 0xcb4   :  { %2675 = vadd.xlane.f32.xlu1 %v2674_v8  ;;  %v2646_v13 = vpop.xlane.xlu1 %2645  ;;  %v2643_v14 = vpop.xlane.xlu0 %2642 }
 0xcb5   :  { %4375 = vpow2.f32 %v2666_v3  ;;  %v2656_v16 = vsub.f32 %v2624_v49, %v2646_v13  ;;  %v2655_v18 = vsub.f32 %v2623_v37, %v2643_v14 }
 0xcb6   :  { %4377 = vpow2.f32 %v2664_v6 }
 0xcb7   :  { %v4372_v19 = vpop.eup %4371  ;;  %v2670_v20 = vmul.f32 1.442695, %v2656_v16  ;;  %v2668_v4 = vmul.f32 1.442695, %v2655_v18 }
 0xcb8   :  { %v2715_v2 = vpop.permute.xlu1 %2714  ;;  %v2649_v22 = vpop.xlane.xlu0 %2648  ;;  %v2677_v15 = vsel %vm168_vm2, %v4372_v19, 0.0 }
 0xcb9   :  { %4379 = vpow2.f32 %v2670_v20  ;;  %v2657_v23 = vsub.f32 %v2625_v11, %v2649_v22  ;;  %4149 = vmatpush3.msra.mxu0 %v2715_v2  ;;  %2678 = vadd.xlane.f32.xlu0 %v2677_v15  ;;  %v3821_v2 = vld [vmem:[%s5150_s4 + $0x20] sm:$0xff] }
 0xcba   :  { %4381 = vpow2.f32 %v2668_v4  ;;  %4158 = vmatprep.subr.mxu0 %v4413_v10 }
 0xcbb   :  { %v4374_v24 = vpop.eup %4373  ;;  %v2672_v26 = vmul.f32 1.442695, %v2657_v23  ;;  %v3823_v23 = vld [vmem:[%s5150_s4 + $0x30] sm:$0xff] }
 0xcbc   :  { %v2792_v27 = vpop.permute.xlu0 %2791  ;;  %v2680_v28 = vsel %vm168_vm2, %v4374_v24, 0.0  ;;  %v2873_v7 = vpop.permute.xlu1 %2872 }
 0xcbd   :  { %4383 = vpow2.f32 %v2672_v26  ;;  %2681 = vadd.xlane.f32.xlu1 %v2680_v28  ;;  %4154 = vmatpush3.msra.mxu1 %v2792_v27 }
 0xcbe   :  { %4163 = vmatprep.subr.mxu1 %v4413_v10 }
 0xcbf   :  { %v4376_v17 = vpop.eup %4375 }
 0xcc0   :  { %v4378_v29 = vpop.eup %4377  ;;  %v2686_v34 = vsel %vm168_vm2, %v4376_v17, 0.0  ;;  %v2954_v40 = vpop.permute.xlu1 %2953 }
 0xcc1   :  { %2687 = vadd.xlane.f32.xlu1 %v2686_v34  ;;  %v2683_v30 = vsel %vm168_vm2, %v4378_v29, 0.0  ;;  %v3035_v41 = vpop.permute.xlu0 %3034 }
 0xcc2   :  { %2684 = vadd.xlane.f32.xlu0 %v2683_v30 }
 0xcc3   :  { %v4380_v31 = vpop.eup %4379 }
 0xcc4   :  { %v4382_v35 = vpop.eup %4381  ;;  %v2692_v38 = vsel %vm168_vm2, %v4380_v31, 0.0  ;;  %v3112_v49 = vpop.permute.xlu1 %3111 }
 0xcc5   :  { %2693 = vadd.xlane.f32.xlu1 %v2692_v38  ;;  %v2689_v36 = vsel %vm168_vm2, %v4382_v35, 0.0 }
 0xcc6   :  { %2690 = vadd.xlane.f32.xlu0 %v2689_v36 }
 0xcc7   :  { %v5007_v37 = vpop.eup %4383 }
 0xcc8   :  { %v2695_v39 = vsel %vm168_vm2, %v5007_v37, 0.0 }
 0xcca   :  { %2696 = vadd.xlane.f32.xlu0 %v2695_v39 }
 0xcd6   :  { %3273 = vrot.lane.b32.xlu1 %v4902_v47, %s5176_s0 }
 0xce0   :  { %3192 = vrot.lane.b32.xlu0 %v4902_v47, %s5175_s13 }
 0xd41   :  { %v2676_v5 = vpop.xlane.xlu1 %2675 }
 0xd42   :  { %4385 = vrcp.f32 %v2676_v5 }
 0xd46   :  { %v2679_v42 = vpop.xlane.xlu0 %2678 }
 0xd47   :  { %4387 = vrcp.f32 %v2679_v42 }
 0xd4a   :  { %v2682_v48 = vpop.xlane.xlu1 %2681 }
 0xd4b   :  { %4389 = vrcp.f32 %v2682_v48  ;;  %v3364_v48 = vrot.slane %v4771_v21, %v4898_v45 }
 0xd4c   :  { %v4386_v11 = vpop.eup %4385 }
 0xd4d   :  { %v2706_v57 = vmul.f32 %v4386_v11, %v4370_v1 }
 0xd4e   :  { %v2688_v46 = vpop.xlane.xlu1 %2687 }
 0xd4f   :  { %4391 = vrcp.f32 %v2688_v46  ;;  %v2685_v63 = vpop.xlane.xlu0 %2684  ;;  %4151 = vmatmul.mubr.msk.f32.vlgmr.msra.gmra.mrb[24].mxu0 %vm168_vm2, %v2706_v57 }
 0xd50   :  { %4393 = vrcp.f32 %v2685_v63  ;;  %4159 = vmatpush3.msra.mxu0 %v2873_v7  ;;  %4160 = vmatprep.mubr.msk.f32.mxu0 %vm4414_vm1, %v4413_v10 }
 0xd51   :  { %v4388_v47 = vpop.eup %4387  ;;  %4168 = vmatprep.subr.mxu0 %v4413_v10 }
 0xd52   :  { %v2707_v0 = vmul.f32 %v4388_v47, %v4372_v19  ;;  %v2694_v50 = vpop.xlane.xlu1 %2693 }
 0xd53   :  { %4395 = vrcp.f32 %v2694_v50  ;;  %v2691_v9 = vpop.xlane.xlu0 %2690 }
 0xd54   :  { %4397 = vrcp.f32 %v2691_v9  ;;  %4156 = vmatmul.mubr.msk.f32.vlgmr.msra.gmra.mrb[34].mxu1 %vm168_vm2, %v2707_v0 }
 0xd55   :  { %v4390_v12 = vpop.eup %4389  ;;  %4164 = vmatpush3.msra.mxu1 %v2954_v40  ;;  %4165 = vmatprep.mubr.msk.f32.mxu1 %vm4414_vm1, %v4413_v10 }
 0xd56   :  { %v2708_v53 = vmul.f32 %v4390_v12, %v4374_v24  ;;  %4173 = vmatprep.subr.mxu1 %v4413_v10  ;;  %v3274_v8 = vpop.permute.xlu1 %3273  ;;  %v3824_v24 = vld [vmem:[%s5150_s4 + $0x38] sm:$0xff] }
 0xd57   :  { %v2697_v56 = vpop.xlane.xlu0 %2696  ;;  %v4281_v26 = vpack.c.bf16 %v3824_v24, %v3823_v23 }
 0xd58   :  { %4399 = vrcp.f32 %v2697_v56  ;;  %4161 = vmatmul.mubr.msk.f32.vlgmr.msra.gmra.mrb[26].mxu0 %vm168_vm2, %v2708_v53 }
 0xd59   :  { %v4392_v58 = vpop.eup %4391  ;;  %4169 = vmatpush3.msra.mxu0 %v3035_v41  ;;  %4170 = vmatprep.mubr.msk.f32.mxu0 %vm4414_vm1, %v4413_v10 }
 0xd5a   :  { %v4394_v59 = vpop.eup %4393  ;;  %v2710_v60 = vmul.f32 %v4392_v58, %v4376_v17  ;;  %4178 = vmatprep.subr.mxu0 %v4413_v10 }
 0xd5b   :  { %v2709_v61 = vmul.f32 %v4394_v59, %v4378_v29  ;;  %v3193_v52 = vpop.permute.xlu0 %3192 }
 0xd5c   :  { %4171 = vmatmul.mubr.msk.f32.vlgmr.msra.gmra.mrb[28].mxu0 %vm168_vm2, %v2710_v60 }
 0xd5d   :  { %v4396_v62 = vpop.eup %4395  ;;  %4166 = vmatmul.mubr.msk.f32.vlgmr.msra.gmra.mrb[36].mxu1 %vm168_vm2, %v2709_v61  ;;  %4179 = vmatpush3.msra.mxu0 %v3193_v52 }
 0xd5e   :  { %v4398_v1 = vpop.eup %4397  ;;  %v2712_v3 = vmul.f32 %v4396_v62, %v4380_v31  ;;  %4174 = vmatpush3.msra.mxu1 %v3112_v49  ;;  %4175 = vmatprep.mubr.msk.f32.mxu1 %vm4414_vm1, %v4413_v10  ;;  %v3828_v62 = vld [vmem:[%s5152_s8 + $0x28] sm:$0xff] }
 0xd5f   :  { %v2711_v6 = vmul.f32 %v4398_v1, %v4382_v35  ;;  %4180 = vmatprep.mubr.msk.f32.mxu0 %vm4414_vm1, %v4413_v10  ;;  %4183 = vmatprep.subr.mxu1 %v4413_v10 }
 0xd60   :  { %4181 = vmatmul.mubr.msk.f32.vlgmr.msra.gmra.mrb[30].mxu0 %vm168_vm2, %v2712_v3  ;;  %v3829_v3 = vld [vmem:[%s5152_s8 + $0x30] sm:$0xff] }
 0xd61   :  { %4176 = vmatmul.mubr.msk.f32.vlgmr.msra.gmra.mrb[38].mxu1 %vm168_vm2, %v2711_v6  ;;  %v3830_v6 = vld [vmem:[%s5152_s8 + $0x38] sm:$0xff] }
 0xd62   :  { %v4400_v13 = vpop.eup %4399  ;;  %4184 = vmatpush3.msra.mxu1 %v3274_v8  ;;  %4185 = vmatprep.mubr.msk.f32.mxu1 %vm4414_vm1, %v4413_v10  ;;  %v3822_v10 = vld [vmem:[%s5150_s4 + $0x28] sm:$0xff]  ;;  %v4289_v8 = vpack.c.bf16 %v3830_v6, %v3829_v3 }
 0xd63   :  { %v2713_v14 = vmul.f32 %v4400_v13, %v5007_v37  ;;  %v4277_v15 = vpack.c.bf16 %v3822_v10, %v3821_v2 }
 0xd65   :  { %4186 = vmatmul.mubr.msk.f32.vlgmr.msra.gmra.mrb[40].mxu1 %vm168_vm2, %v2713_v14  ;;  %4278 = vmatprep.subr.bf16.mxu0 %v4277_v15 }
 0xd66   :  { %4280 = vmatpush3.bf16.msra.mxu0 %v4277_v15 }
 0xd67   :  { %4282 = vmatprep.subr.bf16.mxu0 %v4281_v26 }
 0xd6a   :  { %4284 = vmatpush3.bf16.msra.mxu0 %v4281_v26 }
 0xe22   :  { %v2786_v16 = vpop.f32.mrb[24].mxu0 }
 0xe23   :  { %2790 = vst.msk [vmem:[#allocation2] sm:$0xff] %vm168_vm2, %v2786_v16  ;;  %v4152_v18 = vpop.f32.mrb[25].mxu0 }
 0xe27   :  { %v2863_v19 = vpop.f32.mrb[34].mxu1 }
 0xe28   :  { %2868 = vrot.lane.b32.xlu0 %v2863_v19, %s4426_s28  ;;  %v4157_v20 = vpop.f32.mrb[35].mxu1 }
 0xe2b   :  { %v2944_v4 = vpop.f32.mrb[26].mxu0 }
 0xe2c   :  { %2949 = vrot.lane.b32.xlu1 %v2944_v4, %s4427_s18  ;;  %v4162_v22 = vpop.f32.mrb[27].mxu0  ;;  %v3477_v4 = vrot.slane %v4796_v54, %v4898_v45  ;;  %v3834_v54 = vld [vmem:[%s5155_s10 + $0x48] sm:$0xff] }
 0xe2d   :  { %v3483_v22 = vrot.slane %v4801_v55, %v4898_v45  ;;  %v3835_v55 = vld [vmem:[%s5155_s10 + $0x50] sm:$0xff] }
 0xe2f   :  { %v3106_v27 = vpop.f32.mrb[28].mxu0 }
 0xe30   :  { %v3025_v28 = vpop.f32.mrb[36].mxu1  ;;  %3110 = vst.msk [vmem:[#allocation2 + $0x8] sm:$0xff] %vm168_vm2, %v3106_v27  ;;  %v4172_v17 = vpop.f32.mrb[29].mxu0 }
 0xe31   :  { %3030 = vrot.lane.b32.xlu1 %v3025_v28, %s4428_s29  ;;  %v4167_v29 = vpop.f32.mrb[37].mxu1  ;;  %v3833_v17 = vld [vmem:[%s5155_s10 + $0x40] sm:$0xff] }
 0xe32   :  { %v4293_v29 = vpack.c.bf16 %v3834_v54, %v3833_v17  ;;  %v3719_v17 = vrot.slane %v4876_v32, %v4898_v45 }
 0xe33   :  { %v3264_v34 = vpop.f32.mrb[30].mxu0 }
 0xe34   :  { %v3183_v30 = vpop.f32.mrb[38].mxu1  ;;  %v4182_v31 = vpop.f32.mrb[31].mxu0  ;;  %4294 = vmatprep.subr.bf16.mxu0 %v4293_v29 }
 0xe35   :  { %3188 = vrot.lane.b32.xlu0 %v3183_v30, %s4426_s28  ;;  %v4177_v35 = vpop.f32.mrb[39].mxu1  ;;  %v3837_v31 = vld [vmem:[%s5155_s10 + $0x60] sm:$0xff] }
 0xe36   :  { %v3838_v35 = vld [vmem:[%s5155_s10 + $0x68] sm:$0xff] }
 0xe38   :  { %v3345_v38 = vpop.f32.mrb[40].mxu1 }
 0xe39   :  { %3269 = vrot.lane.b32.xlu0 %v3264_v34, %s4427_s18  ;;  %3350 = vrot.lane.b32.xlu1 %v3345_v38, %s4428_s29  ;;  %v4187_v36 = vpop.f32.mrb[41].mxu1  ;;  %v3836_v34 = vld [vmem:[%s5155_s10 + $0x58] sm:$0xff]  ;;  %v4301_v38 = vpack.c.bf16 %v3838_v35, %v3837_v31  ;;  %v3843_v35 = vld [vmem:[%s5161_s14] ss:$0 sm:$0xff] }
 0xe3a   :  { %v4297_v30 = vpack.c.bf16 %v3836_v34, %v3835_v55  ;;  %v3839_v36 = vld [vmem:[%s5155_s10 + $0x70] sm:$0xff]  ;;  %v3725_v34 = vrot.slane %v4881_v33, %v4898_v45 }
 0xe9a   :  { %v2869_v37 = vpop.permute.xlu0 %2868 }
 0xe9b   :  { %2871 = vst.msk [vmem:[#allocation2] sm:$0xff] %vm1043_vm3, %v2869_v37  ;;  %v3840_v37 = vld [vmem:[%s5155_s10 + $0x78] sm:$0xff] }
 0xe9e   :  { %v2950_v39 = vpop.permute.xlu1 %2949 }
 0xe9f   :  { %2952 = vst.msk [vmem:[#allocation2] sm:$0xff] %vm1125_vm4, %v2950_v39  ;;  %v4305_v39 = vpack.c.bf16 %v3840_v37, %v3839_v36 }
 0xea3   :  { %v3031_v7 = vpop.permute.xlu1 %3030 }
 0xea4   :  { %3033 = vst.msk [vmem:[#allocation2] sm:$0xff] %vm1207_vm5, %v3031_v7  ;;  %v3494_v7 = vrot.slane %v4840_v25, %v4898_v45 }
 0xea7   :  { %v3189_v40 = vpop.permute.xlu0 %3188 }
 0xea8   :  { %3191 = vst.msk [vmem:[#allocation2 + $0x8] sm:$0xff] %vm1043_vm3, %v3189_v40 }
 0xeab   :  { %v3270_v49 = vpop.permute.xlu0 %3269  ;;  %v3351_v5 = vpop.permute.xlu1 %3350  ;;  %v3354_v41 = vld [vmem:[#allocation2] sm:$0xff] }
 0xeac   :  { %3272 = vst.msk [vmem:[#allocation2 + $0x8] sm:$0xff] %vm1125_vm4, %v3270_v49  ;;  %4196 = vmatprep.mubr.msk.f32.mxu0 %vm81_vm0, %v3354_v41 }
 0xead   :  { %3353 = vst.msk [vmem:[#allocation2 + $0x8] sm:$0xff] %vm1207_vm5, %v3351_v5 }
 0xeb4   :  { %v3355_v42 = vld [vmem:[#allocation2 + $0x8] sm:$0xff] }
 0xeb5   :  { %4197 = vmatmul.mubr.msk.f32.vlgmr.msra.gmra.mrb[32].mxu0 %vm81_vm0, %v3355_v42 }
 0xeb6   :  { %4296 = vmatpush3.bf16.msra.mxu0 %v4293_v29 }
 0xeb7   :  { %4298 = vmatprep.subr.bf16.mxu0 %v4297_v30 }
 0xeba   :  { %4300 = vmatpush3.bf16.msra.mxu0 %v4297_v30 }
 0xebb   :  { %4302 = vmatprep.subr.bf16.mxu0 %v4301_v38 }
 0xebe   :  { %4304 = vmatpush3.bf16.msra.mxu0 %v4301_v38 }
 0xebf   :  { %4306 = vmatprep.subr.bf16.mxu0 %v4305_v39 }
 0xec2   :  { %4308 = vmatpush3.bf16.msra.mxu0 %v4305_v39 }
 0xf88   :  { %v4198_v11 = vpop.f32.mrb[32].mxu0 }
 0xf89   :  { %v3443_v57 = vadd.f32 %v4198_v11, %v3364_v48  ;;  %v3437_v46 = vpop.f32.mrb[33].mxu0 }
 0xf8a   :  { %v3438_v63 = vadd.f32 %v3437_v46, %v3364_v48 }
 0xf8b   :  { %v3447_v47 = vadd.f32 %v3443_v57, %v4889_v44 }
 0xf8c   :  { %v3446_v0 = vadd.f32 %v3438_v63, %v4887_v43  ;;  %v3827_v43 = vld [vmem:[%s5152_s8 + $0x20] sm:$0xff] }
 0xf8d   :  { %v3451_v50 = vsel %vm81_vm0, %v3447_v47, 0.0  ;;  %v4285_v1 = vpack.c.bf16 %v3828_v62, %v3827_v43 }
 0xf8e   :  { %3452 = vadd.xlane.f32.xlu1 %v3451_v50  ;;  %v3448_v9 = vsel %vm81_vm0, %v3446_v0, 0.0 }
 0xf8f   :  { %3449 = vadd.xlane.f32.xlu0 %v3448_v9  ;;  %4286 = vmatprep.subr.bf16.mxu1 %v4285_v1 }
 0xf90   :  { %4288 = vmatpush3.bf16.msra.mxu1 %v4285_v1 }
 0xf91   :  { %4290 = vmatprep.subr.bf16.mxu1 %v4289_v8 }
 0xf94   :  { %4292 = vmatpush3.bf16.msra.mxu1 %v4289_v8 }
0x101b   :  { %v3453_v12 = vpop.xlane.xlu1 %3452 }
0x101c   :  { %v3455_v53 = vmul.f32 0.03125, %v3453_v12  ;;  %v3450_v56 = vpop.xlane.xlu0 %3449 }
0x101d   :  { %v3454_v58 = vmul.f32 0.03125, %v3450_v56 }
0x101e   :  { %v3457_v59 = vsub.f32 %v3447_v47, %v3455_v53 }
0x101f   :  { %v3456_v21 = vsub.f32 %v3446_v0, %v3454_v58 }
0x1020   :  { %v3459_v52 = vmul.f32 %v3457_v59, %v3457_v59 }
0x1021   :  { %v3458_v60 = vmul.f32 %v3456_v21, %v3456_v21 }
0x1022   :  { %v3463_v44 = vsel %vm81_vm0, %v3459_v52, 0.0 }
0x1023   :  { %v3460_v61 = vsel %vm81_vm0, %v3458_v60, 0.0 }
0x1024   :  { %3461 = vadd.xlane.f32.xlu0 %v3460_v61  ;;  %v3606_v61 = vrot.slane %v4851_v51, %v4898_v45 }
0x1028   :  { %3464 = vadd.xlane.f32.xlu0 %v3463_v44 }
0x10b1   :  { %v3462_v13 = vpop.xlane.xlu0 %3461 }
0x10b2   :  { %v3466_v14 = vmul.f32 0.03125, %v3462_v13 }
0x10b4   :  { %v3468_v16 = vadd.f32 1e-12, %v3466_v14 }
0x10b5   :  { %v3465_v18 = vpop.xlane.xlu0 %3464 }
0x10b6   :  { %4401 = vrsqrt.f32 %v3468_v16  ;;  %v3467_v19 = vmul.f32 0.03125, %v3465_v18 }
0x10b8   :  { %v3469_v20 = vadd.f32 1e-12, %v3467_v19 }
0x10ba   :  { %4403 = vrsqrt.f32 %v3469_v20 }
0x10c0   :  { %v4402_v2 = vpop.eup %4401 }
0x10c1   :  { %v3472_v10 = vmul.f32 %v4402_v2, %v3456_v21 }
0x10c3   :  { %v3478_v15 = vmul.f32 %v3477_v4, %v3472_v10 }
0x10c4   :  { %v4404_v23 = vpop.eup %4403 }
0x10c5   :  { %v3473_v24 = vmul.f32 %v4404_v23, %v3457_v59  ;;  %v3484_v26 = vadd.f32 %v3483_v22, %v3478_v15 }
0x10c7   :  { %v3479_v27 = vmul.f32 %v3477_v4, %v3473_v24  ;;  %4207 = vmatprep.mubr.msk.f32.mxu1 %vm81_vm0, %v3484_v26 }
0x10c9   :  { %v3485_v28 = vadd.f32 %v3483_v22, %v3479_v27  ;;  %v21_v22 = vstv %s5160_s15 }
0x10ca   :  { %22 = vst [vmem:[#allocation3] sm:$0x1] %v21_v22 }
0x10cb   :  { %4208 = vmatmul.mubr.msk.f32.vlgmr.msra.gmra.mrb[42].mxu1 %vm81_vm0, %v3485_v28 }
0x119e   :  { %v4209_v40 = vpop.f32.mrb[42].mxu1 }
0x119f   :  { %v3573_v49 = vadd.f32 %v4209_v40, %v3494_v7  ;;  %v3567_v5 = vpop.f32.mrb[43].mxu1 }
0x11a0   :  { %v3568_v41 = vadd.f32 %v3567_v5, %v3494_v7 }
0x11a1   :  { %v3579_v42 = vmul.f32 0.044715, %v3573_v49  ;;  %v3577_v59 = vmul.f32 0.5, %v3573_v49 }
0x11a2   :  { %v3578_v48 = vmul.f32 0.044715, %v3568_v41  ;;  %v3576_v25 = vmul.f32 0.5, %v3568_v41 }
0x11a3   :  { %v3581_v11 = vmul.f32 %v3579_v42, %v3573_v49 }
0x11a4   :  { %v3580_v57 = vmul.f32 %v3578_v48, %v3568_v41 }
0x11a5   :  { %v3583_v46 = vmul.f32 %v3581_v11, %v3573_v49 }
0x11a6   :  { %v3582_v63 = vmul.f32 %v3580_v57, %v3568_v41 }
0x11a7   :  { %v3585_v47 = vadd.f32 %v3583_v46, %v3573_v49  ;;  %v3844_v49 = vld [vmem:[#allocation3] ss:$0 sm:$0xff] }
0x11a8   :  { %v3584_v0 = vadd.f32 %v3582_v63, %v3568_v41 }
0x11a9   :  { %v3587_v50 = vmul.f32 0.7978846, %v3585_v47 }
0x11aa   :  { %v3586_v9 = vmul.f32 0.7978846, %v3584_v0 }
0x11ab   :  { %4405 = vtanh.f32 %v3587_v50 }
0x11ac   :  { %4407 = vtanh.f32 %v3586_v9 }
0x11b5   :  { %v4406_v12 = vpop.eup %4405 }
0x11b6   :  { %v4408_v53 = vpop.eup %4407  ;;  %v3591_v56 = vadd.f32 1.0, %v4406_v12 }
0x11b7   :  { %v3590_v58 = vadd.f32 1.0, %v4408_v53 }
0x11b8   :  { %v3593_v60 = vmul.f32 %v3591_v56, %v3577_v59 }
0x11b9   :  { %v3592_v21 = vmul.f32 %v3590_v58, %v3576_v25 }
0x11bb   :  { %4226 = vmatprep.mubr.msk.f32.mxu0 %vm1780_vm6, %v3592_v21 }
0x11bc   :  { %4227 = vmatmul.mubr.msk.f32.vlgmr.msra.gmra.mrb[34].mxu0 %vm1780_vm6, %v3593_v60 }
0x128f   :  { %v4228_v52 = vpop.f32.mrb[34].mxu0 }
0x1290   :  { %v3685_v44 = vadd.f32 %v4228_v52, %v3606_v61  ;;  %v3679_v43 = vpop.f32.mrb[35].mxu0 }
0x1291   :  { %v3680_v62 = vadd.f32 %v3679_v43, %v3606_v61 }
0x1292   :  { %v3689_v1 = vadd.f32 %v3685_v44, %v3485_v28 }
0x1293   :  { %v3688_v3 = vadd.f32 %v3680_v62, %v3484_v26 }
0x1294   :  { %v3693_v6 = vsel %vm81_vm0, %v3689_v1, 0.0 }
0x1295   :  { %3694 = vadd.xlane.f32.xlu0 %v3693_v6  ;;  %v3690_v8 = vsel %vm81_vm0, %v3688_v3, 0.0 }
0x1296   :  { %3691 = vadd.xlane.f32.xlu1 %v3690_v8 }
0x1322   :  { %v3695_v13 = vpop.xlane.xlu0 %3694 }
0x1323   :  { %v3697_v14 = vmul.f32 0.03125, %v3695_v13  ;;  %v3692_v16 = vpop.xlane.xlu1 %3691 }
0x1324   :  { %v3696_v18 = vmul.f32 0.03125, %v3692_v16 }
0x1325   :  { %v3699_v19 = vsub.f32 %v3689_v1, %v3697_v14 }
0x1326   :  { %v3698_v20 = vsub.f32 %v3688_v3, %v3696_v18 }
0x1327   :  { %v3701_v4 = vmul.f32 %v3699_v19, %v3699_v19 }
0x1328   :  { %v3700_v51 = vmul.f32 %v3698_v20, %v3698_v20 }
0x1329   :  { %v3705_v2 = vsel %vm81_vm0, %v3701_v4, 0.0 }
0x132a   :  { %3706 = vadd.xlane.f32.xlu0 %v3705_v2  ;;  %v3702_v10 = vsel %vm81_vm0, %v3700_v51, 0.0 }
0x132b   :  { %3703 = vadd.xlane.f32.xlu1 %v3702_v10 }
0x13b7   :  { %v3707_v15 = vpop.xlane.xlu0 %3706 }
0x13b8   :  { %v3709_v23 = vmul.f32 0.03125, %v3707_v15  ;;  %v3704_v24 = vpop.xlane.xlu1 %3703 }
0x13b9   :  { %v3708_v26 = vmul.f32 0.03125, %v3704_v24 }
0x13ba   :  { %v3711_v27 = vadd.f32 1e-12, %v3709_v23 }
0x13bb   :  { %v3710_v28 = vadd.f32 1e-12, %v3708_v26 }
0x13bc   :  { %4409 = vrsqrt.f32 %v3711_v27 }
0x13bd   :  { %4411 = vrsqrt.f32 %v3710_v28 }
0x13c6   :  { %v4410_v54 = vpop.eup %4409 }
0x13c7   :  { %v4412_v29 = vpop.eup %4411  ;;  %v3715_v55 = vmul.f32 %v4410_v54, %v3699_v19 }
0x13c8   :  { %v3714_v30 = vmul.f32 %v4412_v29, %v3698_v20 }
0x13c9   :  { %v3721_v31 = vmul.f32 %v3719_v17, %v3715_v55 }
0x13ca   :  { %v3720_v38 = vmul.f32 %v3719_v17, %v3714_v30 }
0x13cb   :  { %v3727_v36 = vadd.f32 %v3725_v34, %v3721_v31 }
0x13cc   :  { %v3726_v37 = vadd.f32 %v3725_v34, %v3720_v38 }
0x13cd   :  { %v3737_v39 = vmul.f32 %v3843_v35, %v3727_v36 }
0x13ce   :  { %v3736_v7 = vmul.f32 %v3843_v35, %v3726_v37 }
0x13cf   :  { %v3741_v40 = vsel %vm81_vm0, %v3737_v39, 0.0 }
0x13d0   :  { %3742 = vadd.xlane.f32.xlu0 %v3741_v40  ;;  %v3738_v32 = vsel %vm81_vm0, %v3736_v7, 0.0 }
0x13d1   :  { %3739 = vadd.xlane.f32.xlu1 %v3738_v32 }
0x145d   :  { %v3743_v33 = vpop.xlane.xlu0 %3742 }
0x145e   :  { %v3751_v45 = vadd.f32 %v3844_v49, %v3743_v33  ;;  %v3740_v5 = vpop.xlane.xlu1 %3739 }
0x145f   :  { %v3750_v41 = vadd.f32 %v3844_v49, %v3740_v5 }
0x1460   :  { %3754 = vst.msk [vmem:[%s5162_s16 + $0x8] sm:$0xff] %vm3752_vm7, %v3751_v45 }
0x1461   :  { %3753 = vst.msk [vmem:[%s5162_s16] sm:$0xff] %vm3752_vm7, %v3750_v41 }

</bundles_post_ra>
